<compile_context>
chip_gen: v7x
topology: tpu7x:2x2x1
jax: 0.10.0
libtpu: 0.0.40
codegen_flags: <defaults>
</compile_context>

<pallas_src>
import numpy as np
import jax
import jax.numpy as jnp
from jax import lax
from jax.experimental import pallas as pl
from jax.experimental.pallas import tpu as pltpu

# Static network geometry (fc1 in_features = 16*6*6 implies a 1x32x32 input).
CO1, HO1, WO1 = 6, 30, 30      # conv1 output
HP1, WP1 = 15, 15              # pool1 output
CO2, HO2, WO2 = 16, 13, 13     # conv2 output
HP2, WP2 = 6, 6                # pool2 output (floor mode)
FCP = 128                      # padded FC lane width (120 / 84 / 10 -> 128)


# ------------------------------ fused kernel --------------------------------

def _net_kernel(x_ref, k1_ref, b1_ref, sw1e_ref, sw1o_ref, sh1e_ref, sh1o_ref,
                k2_ref, b2_ref, sw2e_ref, sw2o_ref, sh2e_ref, sh2o_ref,
                fc1w_ref, fc1b_ref, fc2w_ref, fc2b_ref, fc3w_ref, fc3b_ref,
                o_ref):
    nb = x_ref.shape[0]                      # images in this batch block
    f32 = jnp.float32

    def mm(a, b):
        return jnp.dot(a, b, preferred_element_type=f32)

    # conv1 + bias + relu: batch-stacked, K-concatenated banded matmul.
    #   lhs1[n*30+oh, ki*32+j] = x[n, oh+ki, j]           -> [nb*30, 96]
    imgs = [x_ref[n] for n in range(nb)]
    lhs1 = jnp.concatenate(
        [jnp.concatenate([imgs[n][ki:ki + HO1, :] for ki in range(3)], axis=-1)
         for n in range(nb)], axis=0)
    a1 = jnp.maximum(mm(lhs1, k1_ref[...]) + b1_ref[...], 0.0)      # [nb*30, 180]

    # maxpool1 2x2: even/odd selection matmuls + VPU max (no shifted copies).
    cp1 = jnp.maximum(mm(a1, sw1e_ref[...]), mm(a1, sw1o_ref[...]))       # [nb*30, 90]
    p1 = jnp.maximum(mm(sh1e_ref[...], cp1), mm(sh1o_ref[...], cp1))      # [nb*15, 90]

    # conv2 + bias + relu: same K-concat banded matmul on the pooled act.
    #   lhs2[n*13+oh, ki*90+c] = p1[n*15+oh+ki, c]        -> [nb*13, 270]
    lhs2 = jnp.concatenate(
        [jnp.concatenate(
            [p1[n * HP1 + ki: n * HP1 + ki + HO2, :] for ki in range(3)], axis=-1)
         for n in range(nb)], axis=0)
    a2 = jnp.maximum(mm(lhs2, k2_ref[...]) + b2_ref[...], 0.0)      # [nb*13, 208]

    # maxpool2 2x2 (floor): width even/odd, then height even/odd grouped so
    # result rows are hp*nb + n (per-hp blocks contiguous for fc1's flatten).
    cp2 = jnp.maximum(mm(a2, sw2e_ref[...]), mm(a2, sw2o_ref[...]))       # [nb*13, 96]
    pooled = jnp.maximum(mm(sh2e_ref[...], cp2), mm(sh2o_ref[...], cp2))  # [6*nb, 96]

    # fc1 (flatten fused): lane-concat the per-hp blocks -> [nb, 576], one dot.
    flat = jnp.concatenate(
        [pooled[hp * nb:(hp + 1) * nb, :] for hp in range(HP2)], axis=-1)
    h = jnp.maximum(mm(flat, fc1w_ref[...]) + fc1b_ref[...], 0.0)   # [nb, 128]
    h = jnp.maximum(mm(h, fc2w_ref[...]) + fc2b_ref[...], 0.0)      # [nb, 128]
    # single lane-dense store; logits live in lanes 0..9, pads stay 0
    o_ref[...] = mm(h, fc3w_ref[...]) + fc3b_ref[...]


# --------------------- one-time host-side weight prep -----------------------

def prepare_params(p, block_n):
    """Build banded conv matrices, even/odd pooling selection matrices and
    padded / permuted FC weights once, on the host, for one batch-block size."""
    nb = int(block_n)
    w1 = np.asarray(p["w1"], np.float32)        # [6, 1, 3, 3]
    b1 = np.asarray(p["b1"], np.float32)
    w2 = np.asarray(p["w2"], np.float32)        # [16, 6, 3, 3]
    b2 = np.asarray(p["b2"], np.float32)
    fc1_w = np.asarray(p["fc1_w"], np.float32)  # [120, 576]
    fc1_b = np.asarray(p["fc1_b"], np.float32)
    fc2_w = np.asarray(p["fc2_w"], np.float32)  # [84, 120]
    fc2_b = np.asarray(p["fc2_b"], np.float32)
    fc3_w = np.asarray(p["fc3_w"], np.float32)  # [10, 84]
    fc3_b = np.asarray(p["fc3_b"], np.float32)

    # conv1 as ONE banded matmul with K-concatenated band matrix [96, 180]:
    #   out[.., co*30+ow] = sum_{ki,kj} lhs1[.., ki*32 + ow+kj] * w1[co,0,ki,kj]
    k1 = np.zeros((3 * 32, CO1 * WO1), np.float32)
    for ki in range(3):
        for co in range(CO1):
            for ow in range(WO1):
                for kj in range(3):
                    k1[ki * 32 + ow + kj, co * WO1 + ow] = w1[co, 0, ki, kj]
    b1row = np.repeat(b1, WO1)[None, :]                          # [1, 180]

    # pool1 even/odd column selection (width) and block-diag row selection
    # (height, one diagonal block per image in the batch block).
    sw1e = np.zeros((CO1 * WO1, CO1 * WP1), np.float32)
    sw1o = np.zeros_like(sw1e)
    for co in range(CO1):
        for k in range(WP1):
            sw1e[co * WO1 + 2 * k, co * WP1 + k] = 1.0
            sw1o[co * WO1 + 2 * k + 1, co * WP1 + k] = 1.0
    sh1e = np.zeros((nb * HP1, nb * HO1), np.float32)
    sh1o = np.zeros_like(sh1e)
    for n in range(nb):
        for k in range(HP1):
            sh1e[n * HP1 + k, n * HO1 + 2 * k] = 1.0
            sh1o[n * HP1 + k, n * HO1 + 2 * k + 1] = 1.0

    # conv2 as ONE banded matmul with K-concatenated band matrix [270, 208].
    k2 = np.zeros((3 * CO1 * WP1, CO2 * WO2), np.float32)
    for ki in range(3):
        for co in range(CO2):
            for ci in range(CO1):
                for ow in range(WO2):
                    for kj in range(3):
                        k2[ki * (CO1 * WP1) + ci * WP1 + ow + kj,
                           co * WO2 + ow] = w2[co, ci, ki, kj]
    b2row = np.repeat(b2, WO2)[None, :]                          # [1, 208]

    # pool2 (floor mode: last row/col never selected).
    sw2e = np.zeros((CO2 * WO2, CO2 * WP2), np.float32)
    sw2o = np.zeros_like(sw2e)
    for co in range(CO2):
        for k in range(WP2):
            sw2e[co * WO2 + 2 * k, co * WP2 + k] = 1.0
            sw2o[co * WO2 + 2 * k + 1, co * WP2 + k] = 1.0
    # height selection grouped by hp: output row = hp*nb + n.
    sh2e = np.zeros((HP2 * nb, nb * HO2), np.float32)
    sh2o = np.zeros_like(sh2e)
    for hp in range(HP2):
        for n in range(nb):
            sh2e[hp * nb + n, n * HO2 + 2 * hp] = 1.0
            sh2o[hp * nb + n, n * HO2 + 2 * hp + 1] = 1.0

    # fc1: K index = hp*96 + co*6 + wp (matches concat_hp(pooled_hp)), columns
    # permuted from PyTorch's NCHW x.view(-1, 576) order co*36 + hp*6 + wp.
    fc1w = np.zeros((HP2 * CO2 * WP2, FCP), np.float32)          # [576, 128]
    for hp in range(HP2):
        for co in range(CO2):
            for wp in range(WP2):
                fc1w[hp * (CO2 * WP2) + co * WP2 + wp, :120] = \
                    fc1_w[:, co * 36 + hp * 6 + wp]
    fc1b = np.zeros((1, FCP), np.float32); fc1b[0, :120] = fc1_b

    fc2w = np.zeros((FCP, FCP), np.float32); fc2w[:120, :84] = fc2_w.T
    fc2b = np.zeros((1, FCP), np.float32); fc2b[0, :84] = fc2_b
    fc3w = np.zeros((FCP, FCP), np.float32); fc3w[:84, :10] = fc3_w.T
    fc3b = np.zeros((1, FCP), np.float32); fc3b[0, :10] = fc3_b

    arrs = dict(k1=k1, b1row=b1row, sw1e=sw1e, sw1o=sw1o, sh1e=sh1e, sh1o=sh1o,
                k2=k2, b2row=b2row, sw2e=sw2e, sw2o=sw2o, sh2e=sh2e, sh2o=sh2o,
                fc1w=fc1w, fc1b=fc1b, fc2w=fc2w, fc2b=fc2b, fc3w=fc3w, fc3b=fc3b)
    prep = {k: jnp.asarray(v) for k, v in arrs.items()}
    prep["block_n"] = nb
    return prep


# ------------------------------- wrapper -------------------------------------

_WEIGHT_NAMES = ("k1", "b1row", "sw1e", "sw1o", "sh1e", "sh1o",
                 "k2", "b2row", "sw2e", "sw2o", "sh2e", "sh2o",
                 "fc1w", "fc1b", "fc2w", "fc2b", "fc3w", "fc3b")


def net_forward(x_nchw, prep):
    nb = prep["block_n"]
    n = x_nchw.shape[0]
    n_blocks = -(-n // nb)
    n_pad = n_blocks * nb
    # output block second-minor dim must be 8-aligned or the full extent
    assert nb == n_pad or nb % 8 == 0, (nb, n_pad)

    x = x_nchw.reshape(n, 32, 32).astype(jnp.float32)   # single input channel
    if n_pad != n:
        x = jnp.pad(x, ((0, n_pad - n), (0, 0), (0, 0)))

    weights = [prep[k] for k in _WEIGHT_NAMES]

    def resident(arr):
        # full-array block + constant index map: DMA'd once, stays VMEM-resident
        nd = arr.ndim

        def idx(i):
            return (0,) * nd

        return pl.BlockSpec(arr.shape, idx)

    out = pl.pallas_call(
        _net_kernel,
        out_shape=jax.ShapeDtypeStruct((n_pad, FCP), jnp.float32),
        grid=(n_blocks,),
        in_specs=[pl.BlockSpec((nb, 32, 32), lambda i: (i, 0, 0))]
                 + [resident(w) for w in weights],
        out_specs=pl.BlockSpec((nb, FCP), lambda i: (i, 0)),
        compiler_params=pltpu.CompilerParams(
            dimension_semantics=("parallel",)),
    )(x, *weights)
    return out[:n, :10]


# --------------------------- pure-JAX reference -----------------------------

def reference_forward(x_nchw, p):
    hp = lax.Precision.HIGHEST
    x = jnp.transpose(x_nchw, (0, 2, 3, 1)).astype(jnp.float32)

    def conv(y, w, b):
        dn = lax.conv_dimension_numbers(y.shape, w.shape,
                                        ("NHWC", "OIHW", "NHWC"))
        z = lax.conv_general_dilated(y, w, (1, 1), "VALID",
                                     dimension_numbers=dn, precision=hp)
        return jnp.maximum(z + b.reshape(1, 1, 1, -1), 0.0)

    def pool(y):
        return lax.reduce_window(y, -jnp.inf, lax.max,
                                 (1, 2, 2, 1), (1, 2, 2, 1), "VALID")

    y = pool(conv(x, p["w1"], p["b1"]))
    y = pool(conv(y, p["w2"], p["b2"]))
    y = jnp.transpose(y, (0, 3, 1, 2)).reshape(x.shape[0], -1)
    h = jnp.maximum(jnp.dot(y, p["fc1_w"].T, precision=hp) + p["fc1_b"], 0.0)
    h = jnp.maximum(jnp.dot(h, p["fc2_w"].T, precision=hp) + p["fc2_b"], 0.0)
    return jnp.dot(h, p["fc3_w"].T, precision=hp) + p["fc3_b"]


# ------------------------------ params & main -------------------------------

def init_params(key):
    ks = jax.random.split(key, 10)

    def u(k, shape, fan_in):
        bound = float(fan_in) ** -0.5
        return jax.random.uniform(k, shape, jnp.float32, -bound, bound)

    return {
        "w1": u(ks[0], (6, 1, 3, 3), 9),
        "b1": u(ks[1], (6,), 9),
        "w2": u(ks[2], (16, 6, 3, 3), 54),
        "b2": u(ks[3], (16,), 54),
        "fc1_w": u(ks[4], (120, 576), 576),
        "fc1_b": u(ks[5], (120,), 576),
        "fc2_w": u(ks[6], (84, 120), 120),
        "fc2_b": u(ks[7], (84,), 120),
        "fc3_w": u(ks[8], (10, 84), 84),
        "fc3_b": u(ks[9], (10,), 84),
    }


if __name__ == "__main__":
    key = jax.random.PRNGKey(0)
    pkey, xkey = jax.random.split(key)
    params = init_params(pkey)

    batch = 2
    # tiny demo batch -> one grid step with the whole batch stacked along M;
    # for larger batches use block_n=8 (or 16) to get a parallel, pipelined grid
    prep = prepare_params(params, block_n=batch)

    # 16*6*6 in fc1 implies a 32x32 single-channel input.
    x = jax.random.normal(xkey, (batch, 1, 32, 32), dtype=jnp.float32)

    out = jax.block_until_ready(net_forward(x, prep))
    assert out.shape == (batch, 10), out.shape

    ref = jax.block_until_ready(reference_forward(x, params))
    assert jnp.allclose(out, ref, atol=1e-3, rtol=1e-3), float(jnp.abs(out - ref).max())

    print("KERNEL_OK")
</pallas_src>

<mosaic_0001>
module attributes {stable_mosaic.version = 11 : i64} {
  func.func @_net_kernel(%arg0: i32, %arg1: memref<2x32x32xf32, #tpu.memory_space<vmem>>, %arg2: memref<96x180xf32, #tpu.memory_space<vmem>>, %arg3: memref<1x180xf32, #tpu.memory_space<vmem>>, %arg4: memref<180x90xf32, #tpu.memory_space<vmem>>, %arg5: memref<180x90xf32, #tpu.memory_space<vmem>>, %arg6: memref<30x60xf32, #tpu.memory_space<vmem>>, %arg7: memref<30x60xf32, #tpu.memory_space<vmem>>, %arg8: memref<270x208xf32, #tpu.memory_space<vmem>>, %arg9: memref<1x208xf32, #tpu.memory_space<vmem>>, %arg10: memref<208x96xf32, #tpu.memory_space<vmem>>, %arg11: memref<208x96xf32, #tpu.memory_space<vmem>>, %arg12: memref<12x26xf32, #tpu.memory_space<vmem>>, %arg13: memref<12x26xf32, #tpu.memory_space<vmem>>, %arg14: memref<576x128xf32, #tpu.memory_space<vmem>>, %arg15: memref<1x128xf32, #tpu.memory_space<vmem>>, %arg16: memref<128x128xf32, #tpu.memory_space<vmem>>, %arg17: memref<1x128xf32, #tpu.memory_space<vmem>>, %arg18: memref<128x128xf32, #tpu.memory_space<vmem>>, %arg19: memref<1x128xf32, #tpu.memory_space<vmem>>, %arg20: memref<2x128xf32, #tpu.memory_space<vmem>>) attributes {dimension_semantics = [#tpu.dimension_semantics<parallel>], iteration_bounds = array<i64: 1>, scalar_prefetch = 0 : i64, scratch_operands = 0 : i64, tpu.core_type = #tpu.core_type<tc>, window_params = [{transform_indices = @transform_0, window_bounds = array<i64: 2, 32, 32>}, {pipeline_mode = #tpu.pipeline_mode<synchronous>, transform_indices = @transform_1, window_bounds = array<i64: 96, 180>}, {pipeline_mode = #tpu.pipeline_mode<synchronous>, transform_indices = @transform_2, window_bounds = array<i64: 1, 180>}, {pipeline_mode = #tpu.pipeline_mode<synchronous>, transform_indices = @transform_3, window_bounds = array<i64: 180, 90>}, {pipeline_mode = #tpu.pipeline_mode<synchronous>, transform_indices = @transform_4, window_bounds = array<i64: 180, 90>}, {pipeline_mode = #tpu.pipeline_mode<synchronous>, transform_indices = @transform_5, window_bounds = array<i64: 30, 60>}, {pipeline_mode = #tpu.pipeline_mode<synchronous>, transform_indices = @transform_6, window_bounds = array<i64: 30, 60>}, {pipeline_mode = #tpu.pipeline_mode<synchronous>, transform_indices = @transform_7, window_bounds = array<i64: 270, 208>}, {pipeline_mode = #tpu.pipeline_mode<synchronous>, transform_indices = @transform_8, window_bounds = array<i64: 1, 208>}, {pipeline_mode = #tpu.pipeline_mode<synchronous>, transform_indices = @transform_9, window_bounds = array<i64: 208, 96>}, {pipeline_mode = #tpu.pipeline_mode<synchronous>, transform_indices = @transform_10, window_bounds = array<i64: 208, 96>}, {pipeline_mode = #tpu.pipeline_mode<synchronous>, transform_indices = @transform_11, window_bounds = array<i64: 12, 26>}, {pipeline_mode = #tpu.pipeline_mode<synchronous>, transform_indices = @transform_12, window_bounds = array<i64: 12, 26>}, {pipeline_mode = #tpu.pipeline_mode<synchronous>, transform_indices = @transform_13, window_bounds = array<i64: 576, 128>}, {pipeline_mode = #tpu.pipeline_mode<synchronous>, transform_indices = @transform_14, window_bounds = array<i64: 1, 128>}, {pipeline_mode = #tpu.pipeline_mode<synchronous>, transform_indices = @transform_15, window_bounds = array<i64: 128, 128>}, {pipeline_mode = #tpu.pipeline_mode<synchronous>, transform_indices = @transform_16, window_bounds = array<i64: 1, 128>}, {pipeline_mode = #tpu.pipeline_mode<synchronous>, transform_indices = @transform_17, window_bounds = array<i64: 128, 128>}, {pipeline_mode = #tpu.pipeline_mode<synchronous>, transform_indices = @transform_18, window_bounds = array<i64: 1, 128>}, {transform_indices = @transform_19, window_bounds = array<i64: 2, 128>}]} {
    %c0 = arith.constant 0 : index
    %c0_0 = arith.constant 0 : index
    %c0_1 = arith.constant 0 : index
    %0 = vector.load %arg1[%c0, %c0_0, %c0_1] : memref<2x32x32xf32, #tpu.memory_space<vmem>>, vector<1x32x32xf32>
    %1 = vector.shape_cast %0 : vector<1x32x32xf32> to vector<32x32xf32>
    %c1 = arith.constant 1 : index
    %c0_2 = arith.constant 0 : index
    %c0_3 = arith.constant 0 : index
    %2 = vector.load %arg1[%c1, %c0_2, %c0_3] : memref<2x32x32xf32, #tpu.memory_space<vmem>>, vector<1x32x32xf32>
    %3 = vector.shape_cast %2 : vector<1x32x32xf32> to vector<32x32xf32>
    %4 = vector.extract_strided_slice %1 {offsets = [0, 0], sizes = [30, 32], strides = [1, 1]} : vector<32x32xf32> to vector<30x32xf32>
    %5 = vector.extract_strided_slice %1 {offsets = [1, 0], sizes = [30, 32], strides = [1, 1]} : vector<32x32xf32> to vector<30x32xf32>
    %6 = vector.extract_strided_slice %1 {offsets = [2, 0], sizes = [30, 32], strides = [1, 1]} : vector<32x32xf32> to vector<30x32xf32>
    %7 = tpu.concatenate %4, %5, %6 in 1 : vector<30x32xf32>, vector<30x32xf32>, vector<30x32xf32> -> vector<30x96xf32>
    %8 = vector.extract_strided_slice %3 {offsets = [0, 0], sizes = [30, 32], strides = [1, 1]} : vector<32x32xf32> to vector<30x32xf32>
    %9 = vector.extract_strided_slice %3 {offsets = [1, 0], sizes = [30, 32], strides = [1, 1]} : vector<32x32xf32> to vector<30x32xf32>
    %10 = vector.extract_strided_slice %3 {offsets = [2, 0], sizes = [30, 32], strides = [1, 1]} : vector<32x32xf32> to vector<30x32xf32>
    %11 = tpu.concatenate %8, %9, %10 in 1 : vector<30x32xf32>, vector<30x32xf32>, vector<30x32xf32> -> vector<30x96xf32>
    %12 = tpu.concatenate %7, %11 in 0 : vector<30x96xf32>, vector<30x96xf32> -> vector<60x96xf32>
    %c0_4 = arith.constant 0 : index
    %c0_5 = arith.constant 0 : index
    %13 = vector.load %arg2[%c0_4, %c0_5] : memref<96x180xf32, #tpu.memory_space<vmem>>, vector<96x180xf32>
    %cst = arith.constant dense<0.000000e+00> : vector<60x180xf32>
    %14 = tpu.matmul %12, %13, %cst {dimension_numbers = #tpu.dot_dimension_numbers<[1], [0], [0], [1], [0, 0, 1, 1], [], []>} : vector<60x96xf32>, vector<96x180xf32>, vector<60x180xf32> -> vector<60x180xf32>
    %c0_6 = arith.constant 0 : index
    %c0_7 = arith.constant 0 : index
    %15 = vector.load %arg3[%c0_6, %c0_7] : memref<1x180xf32, #tpu.memory_space<vmem>>, vector<1x180xf32>
    %16 = vector.broadcast %15 : vector<1x180xf32> to vector<60x180xf32>
    %17 = arith.addf %14, %16 : vector<60x180xf32>
    %cst_8 = arith.constant 0.000000e+00 : f32
    %18 = vector.broadcast %cst_8 : f32 to vector<60x180xf32>
    %19 = arith.maximumf %17, %18 : vector<60x180xf32>
    %c0_9 = arith.constant 0 : index
    %c0_10 = arith.constant 0 : index
    %20 = vector.load %arg4[%c0_9, %c0_10] : memref<180x90xf32, #tpu.memory_space<vmem>>, vector<180x90xf32>
    %cst_11 = arith.constant dense<0.000000e+00> : vector<60x90xf32>
    %21 = tpu.matmul %19, %20, %cst_11 {dimension_numbers = #tpu.dot_dimension_numbers<[1], [0], [0], [1], [0, 0, 1, 1], [], []>} : vector<60x180xf32>, vector<180x90xf32>, vector<60x90xf32> -> vector<60x90xf32>
    %c0_12 = arith.constant 0 : index
    %c0_13 = arith.constant 0 : index
    %22 = vector.load %arg5[%c0_12, %c0_13] : memref<180x90xf32, #tpu.memory_space<vmem>>, vector<180x90xf32>
    %cst_14 = arith.constant dense<0.000000e+00> : vector<60x90xf32>
    %23 = tpu.matmul %19, %22, %cst_14 {dimension_numbers = #tpu.dot_dimension_numbers<[1], [0], [0], [1], [0, 0, 1, 1], [], []>} : vector<60x180xf32>, vector<180x90xf32>, vector<60x90xf32> -> vector<60x90xf32>
    %24 = arith.maximumf %21, %23 : vector<60x90xf32>
    %c0_15 = arith.constant 0 : index
    %c0_16 = arith.constant 0 : index
    %25 = vector.load %arg6[%c0_15, %c0_16] : memref<30x60xf32, #tpu.memory_space<vmem>>, vector<30x60xf32>
    %cst_17 = arith.constant dense<0.000000e+00> : vector<30x90xf32>
    %26 = tpu.matmul %25, %24, %cst_17 {dimension_numbers = #tpu.dot_dimension_numbers<[1], [0], [0], [1], [0, 0, 1, 1], [], []>} : vector<30x60xf32>, vector<60x90xf32>, vector<30x90xf32> -> vector<30x90xf32>
    %c0_18 = arith.constant 0 : index
    %c0_19 = arith.constant 0 : index
    %27 = vector.load %arg7[%c0_18, %c0_19] : memref<30x60xf32, #tpu.memory_space<vmem>>, vector<30x60xf32>
    %cst_20 = arith.constant dense<0.000000e+00> : vector<30x90xf32>
    %28 = tpu.matmul %27, %24, %cst_20 {dimension_numbers = #tpu.dot_dimension_numbers<[1], [0], [0], [1], [0, 0, 1, 1], [], []>} : vector<30x60xf32>, vector<60x90xf32>, vector<30x90xf32> -> vector<30x90xf32>
    %29 = arith.maximumf %26, %28 : vector<30x90xf32>
    %30 = vector.extract_strided_slice %29 {offsets = [0, 0], sizes = [13, 90], strides = [1, 1]} : vector<30x90xf32> to vector<13x90xf32>
    %31 = vector.extract_strided_slice %29 {offsets = [1, 0], sizes = [13, 90], strides = [1, 1]} : vector<30x90xf32> to vector<13x90xf32>
    %32 = vector.extract_strided_slice %29 {offsets = [2, 0], sizes = [13, 90], strides = [1, 1]} : vector<30x90xf32> to vector<13x90xf32>
    %33 = tpu.concatenate %30, %31, %32 in 1 : vector<13x90xf32>, vector<13x90xf32>, vector<13x90xf32> -> vector<13x270xf32>
    %34 = vector.extract_strided_slice %29 {offsets = [15, 0], sizes = [13, 90], strides = [1, 1]} : vector<30x90xf32> to vector<13x90xf32>
    %35 = vector.extract_strided_slice %29 {offsets = [16, 0], sizes = [13, 90], strides = [1, 1]} : vector<30x90xf32> to vector<13x90xf32>
    %36 = vector.extract_strided_slice %29 {offsets = [17, 0], sizes = [13, 90], strides = [1, 1]} : vector<30x90xf32> to vector<13x90xf32>
    %37 = tpu.concatenate %34, %35, %36 in 1 : vector<13x90xf32>, vector<13x90xf32>, vector<13x90xf32> -> vector<13x270xf32>
    %38 = tpu.concatenate %33, %37 in 0 : vector<13x270xf32>, vector<13x270xf32> -> vector<26x270xf32>
    %c0_21 = arith.constant 0 : index
    %c0_22 = arith.constant 0 : index
    %39 = vector.load %arg8[%c0_21, %c0_22] : memref<270x208xf32, #tpu.memory_space<vmem>>, vector<270x208xf32>
    %cst_23 = arith.constant dense<0.000000e+00> : vector<26x208xf32>
    %40 = tpu.matmul %38, %39, %cst_23 {dimension_numbers = #tpu.dot_dimension_numbers<[1], [0], [0], [1], [0, 0, 1, 1], [], []>} : vector<26x270xf32>, vector<270x208xf32>, vector<26x208xf32> -> vector<26x208xf32>
    %c0_24 = arith.constant 0 : index
    %c0_25 = arith.constant 0 : index
    %41 = vector.load %arg9[%c0_24, %c0_25] : memref<1x208xf32, #tpu.memory_space<vmem>>, vector<1x208xf32>
    %42 = vector.broadcast %41 : vector<1x208xf32> to vector<26x208xf32>
    %43 = arith.addf %40, %42 : vector<26x208xf32>
    %cst_26 = arith.constant 0.000000e+00 : f32
    %44 = vector.broadcast %cst_26 : f32 to vector<26x208xf32>
    %45 = arith.maximumf %43, %44 : vector<26x208xf32>
    %c0_27 = arith.constant 0 : index
    %c0_28 = arith.constant 0 : index
    %46 = vector.load %arg10[%c0_27, %c0_28] : memref<208x96xf32, #tpu.memory_space<vmem>>, vector<208x96xf32>
    %cst_29 = arith.constant dense<0.000000e+00> : vector<26x96xf32>
    %47 = tpu.matmul %45, %46, %cst_29 {dimension_numbers = #tpu.dot_dimension_numbers<[1], [0], [0], [1], [0, 0, 1, 1], [], []>} : vector<26x208xf32>, vector<208x96xf32>, vector<26x96xf32> -> vector<26x96xf32>
    %c0_30 = arith.constant 0 : index
    %c0_31 = arith.constant 0 : index
    %48 = vector.load %arg11[%c0_30, %c0_31] : memref<208x96xf32, #tpu.memory_space<vmem>>, vector<208x96xf32>
    %cst_32 = arith.constant dense<0.000000e+00> : vector<26x96xf32>
    %49 = tpu.matmul %45, %48, %cst_32 {dimension_numbers = #tpu.dot_dimension_numbers<[1], [0], [0], [1], [0, 0, 1, 1], [], []>} : vector<26x208xf32>, vector<208x96xf32>, vector<26x96xf32> -> vector<26x96xf32>
    %50 = arith.maximumf %47, %49 : vector<26x96xf32>
    %c0_33 = arith.constant 0 : index
    %c0_34 = arith.constant 0 : index
    %51 = vector.load %arg12[%c0_33, %c0_34] : memref<12x26xf32, #tpu.memory_space<vmem>>, vector<12x26xf32>
    %cst_35 = arith.constant dense<0.000000e+00> : vector<12x96xf32>
    %52 = tpu.matmul %51, %50, %cst_35 {dimension_numbers = #tpu.dot_dimension_numbers<[1], [0], [0], [1], [0, 0, 1, 1], [], []>} : vector<12x26xf32>, vector<26x96xf32>, vector<12x96xf32> -> vector<12x96xf32>
    %c0_36 = arith.constant 0 : index
    %c0_37 = arith.constant 0 : index
    %53 = vector.load %arg13[%c0_36, %c0_37] : memref<12x26xf32, #tpu.memory_space<vmem>>, vector<12x26xf32>
    %cst_38 = arith.constant dense<0.000000e+00> : vector<12x96xf32>
    %54 = tpu.matmul %53, %50, %cst_38 {dimension_numbers = #tpu.dot_dimension_numbers<[1], [0], [0], [1], [0, 0, 1, 1], [], []>} : vector<12x26xf32>, vector<26x96xf32>, vector<12x96xf32> -> vector<12x96xf32>
    %55 = arith.maximumf %52, %54 : vector<12x96xf32>
    %56 = vector.extract_strided_slice %55 {offsets = [0, 0], sizes = [2, 96], strides = [1, 1]} : vector<12x96xf32> to vector<2x96xf32>
    %57 = vector.extract_strided_slice %55 {offsets = [2, 0], sizes = [2, 96], strides = [1, 1]} : vector<12x96xf32> to vector<2x96xf32>
    %58 = vector.extract_strided_slice %55 {offsets = [4, 0], sizes = [2, 96], strides = [1, 1]} : vector<12x96xf32> to vector<2x96xf32>
    %59 = vector.extract_strided_slice %55 {offsets = [6, 0], sizes = [2, 96], strides = [1, 1]} : vector<12x96xf32> to vector<2x96xf32>
    %60 = vector.extract_strided_slice %55 {offsets = [8, 0], sizes = [2, 96], strides = [1, 1]} : vector<12x96xf32> to vector<2x96xf32>
    %61 = vector.extract_strided_slice %55 {offsets = [10, 0], sizes = [2, 96], strides = [1, 1]} : vector<12x96xf32> to vector<2x96xf32>
    %62 = tpu.concatenate %56, %57, %58, %59, %60, %61 in 1 : vector<2x96xf32>, vector<2x96xf32>, vector<2x96xf32>, vector<2x96xf32>, vector<2x96xf32>, vector<2x96xf32> -> vector<2x576xf32>
    %c0_39 = arith.constant 0 : index
    %c0_40 = arith.constant 0 : index
    %63 = vector.load %arg14[%c0_39, %c0_40] : memref<576x128xf32, #tpu.memory_space<vmem>>, vector<576x128xf32>
    %cst_41 = arith.constant dense<0.000000e+00> : vector<2x128xf32>
    %64 = tpu.matmul %62, %63, %cst_41 {dimension_numbers = #tpu.dot_dimension_numbers<[1], [0], [0], [1], [0, 0, 1, 1], [], []>} : vector<2x576xf32>, vector<576x128xf32>, vector<2x128xf32> -> vector<2x128xf32>
    %c0_42 = arith.constant 0 : index
    %c0_43 = arith.constant 0 : index
    %65 = vector.load %arg15[%c0_42, %c0_43] : memref<1x128xf32, #tpu.memory_space<vmem>>, vector<1x128xf32>
    %66 = vector.broadcast %65 : vector<1x128xf32> to vector<2x128xf32>
    %67 = arith.addf %64, %66 : vector<2x128xf32>
    %cst_44 = arith.constant 0.000000e+00 : f32
    %68 = vector.broadcast %cst_44 : f32 to vector<2x128xf32>
    %69 = arith.maximumf %67, %68 : vector<2x128xf32>
    %c0_45 = arith.constant 0 : index
    %c0_46 = arith.constant 0 : index
    %70 = vector.load %arg16[%c0_45, %c0_46] : memref<128x128xf32, #tpu.memory_space<vmem>>, vector<128x128xf32>
    %cst_47 = arith.constant dense<0.000000e+00> : vector<2x128xf32>
    %71 = tpu.matmul %69, %70, %cst_47 {dimension_numbers = #tpu.dot_dimension_numbers<[1], [0], [0], [1], [0, 0, 1, 1], [], []>} : vector<2x128xf32>, vector<128x128xf32>, vector<2x128xf32> -> vector<2x128xf32>
    %c0_48 = arith.constant 0 : index
    %c0_49 = arith.constant 0 : index
    %72 = vector.load %arg17[%c0_48, %c0_49] : memref<1x128xf32, #tpu.memory_space<vmem>>, vector<1x128xf32>
    %73 = vector.broadcast %72 : vector<1x128xf32> to vector<2x128xf32>
    %74 = arith.addf %71, %73 : vector<2x128xf32>
    %cst_50 = arith.constant 0.000000e+00 : f32
    %75 = vector.broadcast %cst_50 : f32 to vector<2x128xf32>
    %76 = arith.maximumf %74, %75 : vector<2x128xf32>
    %c0_51 = arith.constant 0 : index
    %c0_52 = arith.constant 0 : index
    %77 = vector.load %arg18[%c0_51, %c0_52] : memref<128x128xf32, #tpu.memory_space<vmem>>, vector<128x128xf32>
    %cst_53 = arith.constant dense<0.000000e+00> : vector<2x128xf32>
    %78 = tpu.matmul %76, %77, %cst_53 {dimension_numbers = #tpu.dot_dimension_numbers<[1], [0], [0], [1], [0, 0, 1, 1], [], []>} : vector<2x128xf32>, vector<128x128xf32>, vector<2x128xf32> -> vector<2x128xf32>
    %c0_54 = arith.constant 0 : index
    %c0_55 = arith.constant 0 : index
    %79 = vector.load %arg19[%c0_54, %c0_55] : memref<1x128xf32, #tpu.memory_space<vmem>>, vector<1x128xf32>
    %80 = vector.broadcast %79 : vector<1x128xf32> to vector<2x128xf32>
    %81 = arith.addf %78, %80 : vector<2x128xf32>
    %c0_56 = arith.constant 0 : index
    %c0_57 = arith.constant 0 : index
    %82 = vector.load %arg20[%c0_56, %c0_57] : memref<2x128xf32, #tpu.memory_space<vmem>>, vector<2x128xf32>
    tpu.vector_store %arg20[%c0_56, %c0_57], %81 {strides = array<i32>} : memref<2x128xf32, #tpu.memory_space<vmem>>, vector<2x128xf32>,
    return
  }
  func.func @transform_0(%arg0: i32) -> (i32, i32, i32) {
    %c0_i32 = arith.constant 0 : i32
    %c0_i32_0 = arith.constant 0 : i32
    %c0_i32_1 = arith.constant 0 : i32
    return %arg0, %c0_i32, %c0_i32_0 : i32, i32, i32
  }
  func.func @transform_1(%arg0: i32) -> (i32, i32) {
    %c0_i32 = arith.constant 0 : i32
    %c0_i32_0 = arith.constant 0 : i32
    %c0_i32_1 = arith.constant 0 : i32
    return %c0_i32, %c0_i32_0 : i32, i32
  }
  func.func @transform_2(%arg0: i32) -> (i32, i32) {
    %c0_i32 = arith.constant 0 : i32
    %c0_i32_0 = arith.constant 0 : i32
    %c0_i32_1 = arith.constant 0 : i32
    return %c0_i32, %c0_i32_0 : i32, i32
  }
  func.func @transform_3(%arg0: i32) -> (i32, i32) {
    %c0_i32 = arith.constant 0 : i32
    %c0_i32_0 = arith.constant 0 : i32
    %c0_i32_1 = arith.constant 0 : i32
    return %c0_i32, %c0_i32_0 : i32, i32
  }
  func.func @transform_4(%arg0: i32) -> (i32, i32) {
    %c0_i32 = arith.constant 0 : i32
    %c0_i32_0 = arith.constant 0 : i32
    %c0_i32_1 = arith.constant 0 : i32
    return %c0_i32, %c0_i32_0 : i32, i32
  }
  func.func @transform_5(%arg0: i32) -> (i32, i32) {
    %c0_i32 = arith.constant 0 : i32
    %c0_i32_0 = arith.constant 0 : i32
    %c0_i32_1 = arith.constant 0 : i32
    return %c0_i32, %c0_i32_0 : i32, i32
  }
  func.func @transform_6(%arg0: i32) -> (i32, i32) {
    %c0_i32 = arith.constant 0 : i32
    %c0_i32_0 = arith.constant 0 : i32
    %c0_i32_1 = arith.constant 0 : i32
    return %c0_i32, %c0_i32_0 : i32, i32
  }
  func.func @transform_7(%arg0: i32) -> (i32, i32) {
    %c0_i32 = arith.constant 0 : i32
    %c0_i32_0 = arith.constant 0 : i32
    %c0_i32_1 = arith.constant 0 : i32
    return %c0_i32, %c0_i32_0 : i32, i32
  }
  func.func @transform_8(%arg0: i32) -> (i32, i32) {
    %c0_i32 = arith.constant 0 : i32
    %c0_i32_0 = arith.constant 0 : i32
    %c0_i32_1 = arith.constant 0 : i32
    return %c0_i32, %c0_i32_0 : i32, i32
  }
  func.func @transform_9(%arg0: i32) -> (i32, i32) {
    %c0_i32 = arith.constant 0 : i32
    %c0_i32_0 = arith.constant 0 : i32
    %c0_i32_1 = arith.constant 0 : i32
    return %c0_i32, %c0_i32_0 : i32, i32
  }
  func.func @transform_10(%arg0: i32) -> (i32, i32) {
    %c0_i32 = arith.constant 0 : i32
    %c0_i32_0 = arith.constant 0 : i32
    %c0_i32_1 = arith.constant 0 : i32
    return %c0_i32, %c0_i32_0 : i32, i32
  }
  func.func @transform_11(%arg0: i32) -> (i32, i32) {
    %c0_i32 = arith.constant 0 : i32
    %c0_i32_0 = arith.constant 0 : i32
    %c0_i32_1 = arith.constant 0 : i32
    return %c0_i32, %c0_i32_0 : i32, i32
  }
  func.func @transform_12(%arg0: i32) -> (i32, i32) {
    %c0_i32 = arith.constant 0 : i32
    %c0_i32_0 = arith.constant 0 : i32
    %c0_i32_1 = arith.constant 0 : i32
    return %c0_i32, %c0_i32_0 : i32, i32
  }
  func.func @transform_13(%arg0: i32) -> (i32, i32) {
    %c0_i32 = arith.constant 0 : i32
    %c0_i32_0 = arith.constant 0 : i32
    %c0_i32_1 = arith.constant 0 : i32
    return %c0_i32, %c0_i32_0 : i32, i32
  }
  func.func @transform_14(%arg0: i32) -> (i32, i32) {
    %c0_i32 = arith.constant 0 : i32
    %c0_i32_0 = arith.constant 0 : i32
    %c0_i32_1 = arith.constant 0 : i32
    return %c0_i32, %c0_i32_0 : i32, i32
  }
  func.func @transform_15(%arg0: i32) -> (i32, i32) {
    %c0_i32 = arith.constant 0 : i32
    %c0_i32_0 = arith.constant 0 : i32
    %c0_i32_1 = arith.constant 0 : i32
    return %c0_i32, %c0_i32_0 : i32, i32
  }
  func.func @transform_16(%arg0: i32) -> (i32, i32) {
    %c0_i32 = arith.constant 0 : i32
    %c0_i32_0 = arith.constant 0 : i32
    %c0_i32_1 = arith.constant 0 : i32
    return %c0_i32, %c0_i32_0 : i32, i32
  }
  func.func @transform_17(%arg0: i32) -> (i32, i32) {
    %c0_i32 = arith.constant 0 : i32
    %c0_i32_0 = arith.constant 0 : i32
    %c0_i32_1 = arith.constant 0 : i32
    return %c0_i32, %c0_i32_0 : i32, i32
  }
  func.func @transform_18(%arg0: i32) -> (i32, i32) {
    %c0_i32 = arith.constant 0 : i32
    %c0_i32_0 = arith.constant 0 : i32
    %c0_i32_1 = arith.constant 0 : i32
    return %c0_i32, %c0_i32_0 : i32, i32
  }
  func.func @transform_19(%arg0: i32) -> (i32, i32) {
    %c0_i32 = arith.constant 0 : i32
    %c0_i32_0 = arith.constant 0 : i32
    return %arg0, %c0_i32 : i32, i32
  }
}

</mosaic_0001>

<bundles_post_ra>
// kernel: tpu_custom_call.1
= control target key start
LH: loop header
LB: loop body
LE: loop exit
PB: predicated region body
PF: predicated region fallthrough
CT: control target
= control target key end

     0   :  { %s4504_s0 = inlined_call_operand.hbm [shape: f32[2,32,32], index: 0, kind: input, shape index: {}]   ;;  %s4505_s1 = inlined_call_operand.vmem [shape: f32[96,180], index: 1, kind: input, shape index: {}]   ;;  %s4506_s2 = inlined_call_operand.vmem [shape: f32[1,180], index: 2, kind: input, shape index: {}]   ;;  %s4507_s3 = inlined_call_operand.hbm [shape: f32[180,90], index: 3, kind: input, shape index: {}]   ;;  %s4508_s4 = inlined_call_operand.hbm [shape: f32[180,90], index: 4, kind: input, shape index: {}]   ;;  %s4509_s5 = inlined_call_operand.vmem [shape: f32[30,60], index: 5, kind: input, shape index: {}]   ;;  %s4510_s6 = inlined_call_operand.vmem [shape: f32[30,60], index: 6, kind: input, shape index: {}]   ;;  %s4511_s7 = inlined_call_operand.vmem [shape: f32[270,208], index: 7, kind: input, shape index: {}]   ;;  %s4512_s8 = inlined_call_operand.vmem [shape: f32[1,208], index: 8, kind: input, shape index: {}]   ;;  %s4513_s9 = inlined_call_operand.vmem [shape: f32[208,96], index: 9, kind: input, shape index: {}]   ;;  %s4514_s10 = inlined_call_operand.vmem [shape: f32[208,96], index: 10, kind: input, shape index: {}]   ;;  %s4515_s11 = inlined_call_operand.vmem [shape: f32[12,26], index: 11, kind: input, shape index: {}]   ;;  %s4516_s12 = inlined_call_operand.vmem [shape: f32[12,26], index: 12, kind: input, shape index: {}]   ;;  %s4517_s13 = inlined_call_operand.vmem [shape: f32[576,128], index: 13, kind: input, shape index: {}]   ;;  %s4518_s14 = inlined_call_operand.vmem [shape: f32[1,128], index: 14, kind: input, shape index: {}]   ;;  %s4519_s15 = inlined_call_operand.hbm [shape: f32[128,128], index: 15, kind: input, shape index: {}]   ;;  %s4520_s16 = inlined_call_operand.vmem [shape: f32[1,128], index: 16, kind: input, shape index: {}]   ;;  %s4521_s17 = inlined_call_operand.hbm [shape: f32[128,128], index: 17, kind: input, shape index: {}]   ;;  %s4522_s18 = inlined_call_operand.vmem [shape: f32[1,128], index: 18, kind: input, shape index: {}]   ;;  %s4523_s19 = inlined_call_operand.hbm [shape: f32[2,128], index: 19, kind: output, shape index: {}]  }
   0x1   :  { %4528 = sst [smem:[#allocation16_spill]] %s4504_s0 }
   0x2   :  { %4529 = sst [smem:[#allocation17_spill]] %s4505_s1 }
   0x3   :  { %4530 = sst [smem:[#allocation18_spill]] %s4506_s2 }
   0x4   :  { %4531 = sst [smem:[#allocation19_spill]] %s4507_s3 }
   0x5   :  { %4532 = sst [smem:[#allocation20_spill]] %s4522_s18 }
   0x6   :  { %4533 = sst [smem:[#allocation21_spill]] %s4523_s19 }
   0x7   :  { %24 = vsyncpa [#allocation3], 0 }
   0x8   :  { %25 = vsyncpa [#allocation6], 0 }
   0x9   :  { %26 = vsyncpa [#allocation9], 0 }
   0xa   :  { %27 = vsyncpa [#allocation4], 0  ;;  %s3216_s0 = smov [#allocation5]   ;;  %s3217_s20 = smov [#allocation8]  }
   0xb   :  { %s49_s30 = sshll.u32 %s3216_s0, 4  ;;  %s93_s21 = sshll.u32 %s3217_s20, 4  ;;  %s50_s30 = int_to_ptr.vmem [resolvable:$true] %s49_s30  ;;  %s3333_s21 = int_to_ptr.vmem [resolvable:$true] %s93_s21 }
   0xc   :  { %s4534_s2 = sld [smem:[#allocation19_spill]] }
  0x12   :  { %s3076_s23 = scalar_lea.hbm %s4534_s2, 2944 }
  0x13   :  { %p3077_p0 = scmp.ne.s32.totalorder %s4534_s2, %s3076_s23  ;;  %p3080_p1 = scmp.lt.u32.totalorder %s3076_s23, %s4534_s2 }
  0x15   :  { %p3082_p2 = pnand %p3080_p1, %p3077_p0 }
  0x17   :  { %3085 = shalt.err (!%p3082_p2)
}
  0x18   :  { %s3086_s27 = scalar_lea.vmem %s50_s30, 2944  ;;  %p3091_p4 = scmp.lt.s32.totalorder %s50_s30, %s50_s30 }
  0x19   :  { %p3087_p3 = scmp.ne.s32.totalorder %s50_s30, %s3086_s27  ;;  %p3092_p5 = scmp.lt.s32.totalorder %s3086_s27, %s3086_s27 }
  0x1b   :  { %p3093_p6 = por %p3092_p5, %p3091_p4 }
  0x1d   :  { %p3094_p7 = pnand %p3093_p6, %p3087_p3 }
  0x1f   :  { %3097 = shalt.err (!%p3094_p7)
}
  0x20   :  { %s3218_s28 = smov 128   ;;  %s3219_s29 = smov 8  }
  0x21   :  { %55 = dma.hbm_to_vmem [thread:$0]  %s4534_s2, 2944, %s50_s30, [#allocation6], %s3218_s28, %s3218_s28, %s3219_s29  }
  0x22   :  { %s3098_s23 = scalar_lea.hbm %s4519_s15, 2048 }
  0x23   :  { %p3099_p8 = scmp.ne.s32.totalorder %s4519_s15, %s3098_s23  ;;  %p3102_p9 = scmp.lt.u32.totalorder %s3098_s23, %s4519_s15 }
  0x25   :  { %p3104_p10 = pnand %p3102_p9, %p3099_p8 }
  0x27   :  { %3107 = shalt.err (!%p3104_p10)
}
  0x28   :  { %s3108_s27 = scalar_lea.vmem %s3333_s21, 2048  ;;  %p3113_p12 = scmp.lt.s32.totalorder %s3333_s21, %s3333_s21 }
  0x29   :  { %p3109_p11 = scmp.ne.s32.totalorder %s3333_s21, %s3108_s27  ;;  %p3114_p13 = scmp.lt.s32.totalorder %s3108_s27, %s3108_s27 }
  0x2b   :  { %p3115_p0 = por %p3114_p13, %p3113_p12 }
  0x2d   :  { %p3116_p1 = pnand %p3115_p0, %p3109_p11 }
  0x2f   :  { %3119 = shalt.err (!%p3116_p1)
}
  0x30   :  { %99 = dma.hbm_to_vmem [thread:$0]  %s4519_s15, 2048, %s3333_s21, [#allocation9], %s3218_s28, %s3218_s28, %s3219_s29  }
  0x31   :  { %s3220_s0 = smov [#allocation2]   ;;  %s3221_s1 = smov [#allocation7]  }
  0x32   :  { %s33_s20 = sshll.u32 %s3220_s0, 4  ;;  %s61_s22 = sshll.u32 %s3221_s1, 4  ;;  %s34_s20 = int_to_ptr.vmem [resolvable:$true] %s33_s20  ;;  %s3370_s22 = int_to_ptr.vmem [resolvable:$true] %s61_s22 }
  0x33   :  { %s4535_s25 = sld [smem:[#allocation16_spill]] }
  0x39   :  { %s3120_s3 = scalar_lea.hbm %s4535_s25, 1024 }
  0x3a   :  { %p3121_p2 = scmp.ne.s32.totalorder %s4535_s25, %s3120_s3  ;;  %p3124_p3 = scmp.lt.u32.totalorder %s3120_s3, %s4535_s25 }
  0x3c   :  { %p3126_p4 = pnand %p3124_p3, %p3121_p2 }
  0x3e   :  { %3129 = shalt.err (!%p3126_p4)
}
  0x3f   :  { %s3130_s15 = scalar_lea.vmem %s34_s20, 1024  ;;  %p3135_p6 = scmp.lt.s32.totalorder %s34_s20, %s34_s20 }
  0x40   :  { %p3131_p5 = scmp.ne.s32.totalorder %s34_s20, %s3130_s15  ;;  %p3136_p7 = scmp.lt.s32.totalorder %s3130_s15, %s3130_s15 }
  0x42   :  { %p3137_p8 = por %p3136_p7, %p3135_p6 }
  0x44   :  { %p3138_p9 = pnand %p3137_p8, %p3131_p5 }
  0x46   :  { %3141 = shalt.err (!%p3138_p9)
}
  0x47   :  { %39 = dma.hbm_to_vmem [thread:$0]  %s4535_s25, 1024, %s34_s20, [#allocation3], %s3218_s28, %s3218_s28, %s3219_s29  }
  0x48   :  { %s3142_s18 = scalar_lea.hbm %s4508_s4, 2944 }
  0x49   :  { %p3143_p10 = scmp.ne.s32.totalorder %s4508_s4, %s3142_s18  ;;  %p3146_p11 = scmp.lt.u32.totalorder %s3142_s18, %s4508_s4 }
  0x4b   :  { %p3148_p12 = pnand %p3146_p11, %p3143_p10 }
  0x4d   :  { %3151 = shalt.err (!%p3148_p12)
}
  0x4e   :  { %s3152_s3 = scalar_lea.vmem %s3370_s22, 2944  ;;  %p3157_p0 = scmp.lt.s32.totalorder %s3370_s22, %s3370_s22 }
  0x4f   :  { %p3153_p13 = scmp.ne.s32.totalorder %s3370_s22, %s3152_s3  ;;  %p3158_p1 = scmp.lt.s32.totalorder %s3152_s3, %s3152_s3 }
  0x51   :  { %p3159_p2 = por %p3158_p1, %p3157_p0 }
  0x53   :  { %p3160_p3 = pnand %p3159_p2, %p3153_p13 }
  0x55   :  { %3163 = shalt.err (!%p3160_p3)
}
  0x56   :  { %67 = dma.hbm_to_vmem [thread:$0]  %s4508_s4, 2944, %s3370_s22, [#allocation6], %s3218_s28, %s3218_s28, %s3219_s29  }
  0x57   :  { %s3222_s26 = smov [#allocation10]   ;;  %s3164_s30 = scalar_lea.hbm %s4521_s17, 2048 }
  0x58   :  { %s107_s27 = sshll.u32 %s3222_s26, 4  ;;  %p3165_p4 = scmp.ne.s32.totalorder %s4521_s17, %s3164_s30  ;;  %s108_s27 = int_to_ptr.vmem [resolvable:$true] %s107_s27 }
  0x59   :  { %p3168_p5 = scmp.lt.u32.totalorder %s3164_s30, %s4521_s17 }
  0x5b   :  { %p3170_p6 = pnand %p3168_p5, %p3165_p4 }
  0x5d   :  { %3173 = shalt.err (!%p3170_p6)
}
  0x5e   :  { %s3174_s1 = scalar_lea.vmem %s108_s27, 2048  ;;  %p3179_p8 = scmp.lt.s32.totalorder %s108_s27, %s108_s27 }
  0x5f   :  { %p3175_p7 = scmp.ne.s32.totalorder %s108_s27, %s3174_s1  ;;  %p3180_p9 = scmp.lt.s32.totalorder %s3174_s1, %s3174_s1 }
  0x61   :  { %p3181_p10 = por %p3180_p9, %p3179_p8 }
  0x63   :  { %p3182_p11 = pnand %p3181_p10, %p3175_p7 }
  0x65   :  { %3185 = shalt.err (!%p3182_p11)
}
  0x66   :  { %113 = dma.hbm_to_vmem [thread:$0]  %s4521_s17, 2048, %s108_s27, [#allocation9], %s3218_s28, %s3218_s28, %s3219_s29  }
  0x67   :  { %3208 = dma.done.wait [#allocation3], 1024  }
  0x68   :  { %3209 = vsyncadd [#allocation3], 4294966272 }
  0x69   :  { %3210 = dma.done.wait [#allocation6], 5888  }
  0x6a   :  { %3211 = vsyncadd [#allocation6], 4294961408 }
  0x6b   :  { %3212 = dma.done.wait [#allocation9], 4096  }
  0x6c   :  { %3213 = vsyncadd [#allocation9], 4294963200  ;;  %v3223_v0 = vmov 0.0   ;;  %v3423_v1 = vld [vmem:[#allocation2 + $0x8] sm:$0xff]  ;;  %v3425_v2 = vld [vmem:[#allocation2 + $0x10] sm:$0xff]  ;;  %vm144_vm0 = vcmask 1046528  }
  0x6d   :  { %378 = vmatprep.mubr.f32.mxu0 %v3223_v0  ;;  %v3427_v3 = vld [vmem:[#allocation2] sm:$0xff]  ;;  %v146_v4 = vrot.slane %v3423_v1, 1  ;;  %v148_v5 = vrot.slane %v3425_v2, 1  ;;  %v166_v7 = vrot.slane %v3423_v1, 2  ;;  %vm164_vm1 = vcmask 1045504   ;;  %v3435_v10 = vld [vmem:[#allocation2 + $0x18] sm:$0xff] }
  0x6e   :  { %v145_v6 = vrot.slane %v3427_v3, 1  ;;  %v168_v8 = vrot.slane %v3425_v2, 2  ;;  %v165_v9 = vrot.slane %v3427_v3, 2  ;;  %s4536_s29 = sld [smem:[#allocation17_spill]]  ;;  %s3224_s3 = smov 32   ;;  %v3447_v15 = vld [vmem:[#allocation2 + $0x20] sm:$0xff] }
  0x6f   :  { %v149_v11 = vsel %vm144_vm0, %v146_v4, %v148_v5  ;;  %v150_v20 = vrot.slane %v3435_v10, 1  ;;  %v170_v21 = vrot.slane %v3435_v10, 2  ;;  %v3459_v22 = vld [vmem:[#allocation2 + $0x28] sm:$0xff]  ;;  %s3225_s4 = smov 64   ;;  %v198_v30 = vrot.slane %v3447_v15, 1  ;;  %v3503_v46 = vld [vmem:[#allocation2 + $0x30] sm:$0xff] }
  0x70   :  { %v147_v12 = vsel %vm144_vm0, %v145_v6, %v146_v4  ;;  %154 = vrot.lane.b32.xlu1 %v149_v11, %s3224_s3  ;;  %v169_v18 = vsel %vm164_vm1, %v166_v7, %v168_v8  ;;  %v167_v19 = vsel %vm164_vm1, %v165_v9, %v166_v7  ;;  %v199_v31 = vrot.slane %v3459_v22, 1  ;;  %v3521_v55 = vld [vmem:[#allocation2 + $0x38] sm:$0xff]  ;;  %s4537_s1 = sld [smem:[#allocation18_spill]]  ;;  %s3229_s20 = smov 90  }
  0x71   :  { %152 = vrot.lane.b32.xlu0 %v147_v12, %s3224_s3  ;;  %v151_v34 = vsel %vm144_vm0, %v148_v5, %v150_v20  ;;  %v171_v35 = vsel %vm164_vm1, %v168_v8, %v170_v21  ;;  %v217_v36 = vrot.slane %v3447_v15, 2  ;;  %v218_v37 = vrot.slane %v3459_v22, 2  ;;  %s4542_s21 = sld [smem:[#allocation20_spill]] }
  0x72   :  { %v200_v44 = vsel %vm144_vm0, %v198_v30, %v199_v31  ;;  %v201_v53 = vrot.slane %v3503_v46, 1  ;;  %v220_v54 = vrot.slane %v3503_v46, 2  ;;  %v203_v4 = vrot.slane %v3521_v55, 1  ;;  %v452_v30 = vld [vmem:[#allocation5 + $0x48] sm:$0xff] }
  0x73   :  { %v219_v45 = vsel %vm164_vm1, %v217_v36, %v218_v37  ;;  %v222_v5 = vrot.slane %v3521_v55, 2  ;;  %v456_v36 = vld [vmem:[#allocation5 + $0x68] sm:$0xff]  ;;  %vm184_vm2 = vcmask 261120   ;;  %vm189_vm3 = vcmask 523264  }
  0x74   :  { %v258_v13 = vld [vmem:[%s4536_s29 + $0x8] sm:$0xff]  ;;  %v260_v14 = vld [vmem:[%s4536_s29 + $0x18] sm:$0xff]  ;;  %v257_v16 = vld [vmem:[%s4536_s29] sm:$0xff]  ;;  %174 = vrot.lane.b32.xlu1 %v169_v18, %s3225_s4  ;;  %v202_v62 = vsel %vm144_vm0, %v199_v31, %v201_v53  ;;  %v221_v63 = vsel %vm164_vm1, %v218_v37, %v220_v54  ;;  %v204_v11 = vsel %vm144_vm0, %v201_v53, %v203_v4  ;;  %vm293_vm4 = vcmask 785408  }
  0x75   :  { %v259_v17 = vld [vmem:[%s4536_s29 + $0x10] sm:$0xff]  ;;  %v262_v23 = vld [vmem:[%s4536_s29 + $0x28] sm:$0xff]  ;;  %v264_v24 = vld [vmem:[%s4536_s29 + $0x38] sm:$0xff]  ;;  %v2615_v25 = vpack.c.bf16 %v260_v14, %v258_v13  ;;  %172 = vrot.lane.b32.xlu0 %v167_v19, %s3225_s4  ;;  %v223_v12 = vsel %vm164_vm1, %v220_v54, %v222_v5  ;;  %vm491_vm5 = vcmask 1043456   ;;  %vm466_vm6 = vcmask 424960  }
  0x76   :  { %v2617_v26 = vpack.c.bf16 %v259_v17, %v257_v16  ;;  %v2619_v27 = vpack.c.bf16 %v264_v24, %v262_v23  ;;  %v261_v28 = vld [vmem:[%s4536_s29 + $0x20] sm:$0xff]  ;;  %v263_v29 = vld [vmem:[%s4536_s29 + $0x30] sm:$0xff]  ;;  %v266_v32 = vld [vmem:[%s4536_s29 + $0x48] sm:$0xff]  ;;  %v3226_v17 = vmov 0.0|0.0   ;;  %vm743_vm7 = vcmask 490496  }
  0x77   :  { %v268_v33 = vld [vmem:[%s4536_s29 + $0x58] sm:$0xff]  ;;  %2616 = vmatprep.subr.bf16.mxu0 %v2615_v25  ;;  %v2621_v38 = vpack.c.bf16 %v263_v29, %v261_v28  ;;  %v265_v40 = vld [vmem:[%s4536_s29 + $0x40] sm:$0xff]  ;;  %v267_v41 = vld [vmem:[%s4536_s29 + $0x50] sm:$0xff]  ;;  %2639 = vmatprep.subr.bf16.mxu1 %v3226_v17  ;;  %vm3227_vm8 = vmmov 1   ;;  %vm969_vm11 = vcmask 736256   ;;  %vm1034_vm12 = vcmask 1044480  }
  0x78   :  { %2618 = vmatpush1.bf16.msra.mxu0 %v2617_v26  ;;  %v2623_v39 = vpack.c.bf16 %v268_v33, %v266_v32  ;;  %176 = vrot.lane.b32.xlu1 %v171_v35, %s3225_s4  ;;  %v270_v42 = vld [vmem:[%s4536_s29 + $0x68] sm:$0xff]  ;;  %v272_v43 = vld [vmem:[%s4536_s29 + $0x78] sm:$0xff]  ;;  %v2625_v47 = vpack.c.bf16 %v267_v41, %v265_v40  ;;  %v269_v49 = vld [vmem:[%s4536_s29 + $0x60] sm:$0xff]  ;;  %vm1118_vm13 = vcmask 113664   ;;  %vm1346_vm14 = vcmask 654336  }
  0x79   :  { %2620 = vmatprep.subr.bf16.mxu0 %v2619_v27  ;;  %156 = vrot.lane.b32.xlu0 %v151_v34, %s3224_s3  ;;  %v2627_v48 = vpack.c.bf16 %v272_v43, %v270_v42  ;;  %v271_v50 = vld [vmem:[%s4536_s29 + $0x70] sm:$0xff]  ;;  %v274_v51 = vld [vmem:[%s4536_s29 + $0x88] sm:$0xff]  ;;  %v276_v52 = vld [vmem:[%s4536_s29 + $0x98] sm:$0xff]  ;;  %vm1561_vm15 = vcmask 211968  }
  0x7a   :  { %v2629_v56 = vpack.c.bf16 %v271_v50, %v269_v49  ;;  %v2631_v57 = vpack.c.bf16 %v276_v52, %v274_v51  ;;  %v273_v58 = vld [vmem:[%s4536_s29 + $0x80] sm:$0xff]  ;;  %v275_v59 = vld [vmem:[%s4536_s29 + $0x90] sm:$0xff]  ;;  %v278_v60 = vld [vmem:[%s4536_s29 + $0xa8] sm:$0xff] }
  0x7b   :  { %v280_v61 = vld [vmem:[%s4536_s29 + $0xb8] sm:$0xff]  ;;  %v2633_v6 = vpack.c.bf16 %v275_v59, %v273_v58  ;;  %v277_v8 = vld [vmem:[%s4536_s29 + $0xa0] sm:$0xff]  ;;  %v279_v9 = vld [vmem:[%s4536_s29 + $0xb0] sm:$0xff]  ;;  %s3230_s29 = smov 96  }
  0x7c   :  { %2622 = vmatpush1.bf16.msra.mxu0 %v2621_v38  ;;  %224 = vrot.lane.b32.xlu1 %v219_v45, %s3225_s4  ;;  %v2635_v7 = vpack.c.bf16 %v280_v61, %v278_v60  ;;  %v2637_v13 = vpack.c.bf16 %v279_v9, %v277_v8  ;;  %v443_v14 = vld [vmem:[#allocation5] sm:$0xff]  ;;  %v444_v16 = vld [vmem:[#allocation5 + $0x8] sm:$0xff]  ;;  %v445_v19 = vld [vmem:[#allocation5 + $0x10] sm:$0xff] }
  0x7d   :  { %2624 = vmatprep.subr.bf16.mxu0 %v2623_v39  ;;  %205 = vrot.lane.b32.xlu0 %v200_v44, %s3224_s3  ;;  %v2640_v18 = vpack.c.bf16 %v444_v16, %v443_v14  ;;  %v447_v23 = vld [vmem:[#allocation5 + $0x20] sm:$0xff]  ;;  %v448_v24 = vld [vmem:[#allocation5 + $0x28] sm:$0xff]  ;;  %v449_v26 = vld [vmem:[#allocation5 + $0x30] sm:$0xff] }
  0x7e   :  { %v2646_v25 = vpack.c.bf16 %v448_v24, %v447_v23  ;;  %v450_v27 = vld [vmem:[#allocation5 + $0x38] sm:$0xff]  ;;  %v451_v29 = vld [vmem:[#allocation5 + $0x40] sm:$0xff]  ;;  %v453_v32 = vld [vmem:[#allocation5 + $0x50] sm:$0xff] }
  0x7f   :  { %2641 = vmatpush1.bf16.msra.mxu1 %v2640_v18  ;;  %v2649_v28 = vpack.c.bf16 %v450_v27, %v449_v26  ;;  %v2652_v31 = vpack.c.bf16 %v452_v30, %v451_v29  ;;  %v454_v33 = vld [vmem:[#allocation5 + $0x58] sm:$0xff]  ;;  %v455_v35 = vld [vmem:[#allocation5 + $0x60] sm:$0xff]  ;;  %v457_v38 = vld [vmem:[#allocation5 + $0x70] sm:$0xff] }
  0x80   :  { %2626 = vmatpush1.bf16.msra.mxu0 %v2625_v47  ;;  %178 = vrot.lane.b32.xlu1 %v170_v21, %s3225_s4  ;;  %v2655_v34 = vpack.c.bf16 %v454_v33, %v453_v32  ;;  %v2658_v37 = vpack.c.bf16 %v456_v36, %v455_v35  ;;  %v458_v39 = vld [vmem:[#allocation5 + $0x78] sm:$0xff]  ;;  %v459_v41 = vld [vmem:[#allocation5 + $0x80] sm:$0xff]  ;;  %v460_v42 = vld [vmem:[#allocation5 + $0x88] sm:$0xff] }
  0x81   :  { %2628 = vmatprep.subr.bf16.mxu0 %v2627_v48  ;;  %158 = vrot.lane.b32.xlu0 %v150_v20, %s3224_s3  ;;  %v446_v20 = vld [vmem:[#allocation5 + $0x18] sm:$0xff]  ;;  %v2661_v40 = vpack.c.bf16 %v458_v39, %v457_v38  ;;  %v2664_v43 = vpack.c.bf16 %v460_v42, %v459_v41  ;;  %v461_v44 = vld [vmem:[#allocation5 + $0x90] sm:$0xff]  ;;  %v601_v51 = vld [vmem:[#allocation7 + $0x8] sm:$0xff] }
  0x82   :  { %v2643_v21 = vpack.c.bf16 %v446_v20, %v445_v19  ;;  %2642 = vmatprep.subr.bf16.mxu1 %v3226_v17  ;;  %v462_v45 = vld [vmem:[#allocation5 + $0x98] sm:$0xff]  ;;  %v603_v58 = vld [vmem:[#allocation7 + $0x18] sm:$0xff]  ;;  %v609_v20 = vld [vmem:[#allocation7 + $0x48] sm:$0xff] }
  0x83   :  { %v2667_v47 = vpack.c.bf16 %v462_v45, %v461_v44  ;;  %v600_v50 = vld [vmem:[#allocation7] sm:$0xff]  ;;  %v611_v29 = vld [vmem:[#allocation7 + $0x58] sm:$0xff]  ;;  %v613_v36 = vld [vmem:[#allocation7 + $0x68] sm:$0xff] }
  0x84   :  { %2630 = vmatpush1.bf16.msra.mxu0 %v2629_v56  ;;  %226 = vrot.lane.b32.xlu1 %v221_v63, %s3225_s4  ;;  %v2673_v52 = vpack.c.bf16 %v601_v51, %v600_v50  ;;  %v608_v19 = vld [vmem:[#allocation7 + $0x40] sm:$0xff]  ;;  %v615_v44 = vld [vmem:[#allocation7 + $0x78] sm:$0xff]  ;;  %v617_v51 = vld [vmem:[#allocation7 + $0x88] sm:$0xff] }
  0x85   :  { %2632 = vmatprep.subr.bf16.mxu0 %v2631_v57  ;;  %207 = vrot.lane.b32.xlu0 %v202_v62, %s3224_s3  ;;  %v602_v57 = vld [vmem:[#allocation7 + $0x10] sm:$0xff]  ;;  %v612_v35 = vld [vmem:[#allocation7 + $0x60] sm:$0xff]  ;;  %vm3677_vm9 = vmpackc.low %vm491_vm5, %vm3227_vm8 }
  0x86   :  { %2644 = vmatpush1.bf16.msra.mxu1 %v2643_v21  ;;  %v2676_v60 = vpack.c.bf16 %v603_v58, %v602_v57  ;;  %v616_v50 = vld [vmem:[#allocation7 + $0x80] sm:$0xff]  ;;  %v463_v57 = vld [vmem:[#allocation5 + $0xa0] sm:$0xff]  ;;  %v464_v58 = vld [vmem:[#allocation5 + $0xa8] sm:$0xff] }
  0x87   :  { %2645 = vmatprep.subr.bf16.mxu1 %v3226_v17  ;;  %vm3936_vm10 = vmpackc.low %vm164_vm1, %vm3227_vm8 }
  0x88   :  { %2634 = vmatpush1.bf16.msra.mxu0 %v2633_v6  ;;  %228 = vrot.lane.b32.xlu1 %v223_v12, %s3225_s4 }
  0x89   :  { %2636 = vmatprep.subr.bf16.mxu0 %v2635_v7  ;;  %209 = vrot.lane.b32.xlu0 %v204_v11, %s3224_s3  ;;  %v607_v11 = vld [vmem:[#allocation7 + $0x38] sm:$0xff] }
  0x8a   :  { %2647 = vmatpush1.bf16.msra.mxu1 %v2646_v25  ;;  %v2685_v25 = vpack.c.bf16 %v609_v20, %v608_v19 }
  0x8b   :  { %2648 = vmatprep.subr.bf16.mxu1 %v3226_v17 }
  0x8c   :  { %2638 = vmatpush1.bf16.msra.mxu0 %v2637_v13  ;;  %230 = vrot.lane.b32.xlu1 %v222_v5, %s3225_s4 }
  0x8d   :  { %2672 = vmatprep.subr.bf16.mxu0 %v3226_v17  ;;  %211 = vrot.lane.b32.xlu0 %v203_v4, %s3224_s3  ;;  %v605_v4 = vld [vmem:[#allocation7 + $0x28] sm:$0xff] }
  0x8e   :  { %2650 = vmatpush1.bf16.msra.mxu1 %v2649_v28  ;;  %v610_v28 = vld [vmem:[#allocation7 + $0x50] sm:$0xff] }
  0x8f   :  { %2651 = vmatprep.subr.bf16.mxu1 %v3226_v17  ;;  %v2688_v32 = vpack.c.bf16 %v611_v29, %v610_v28 }
  0x92   :  { %2653 = vmatpush1.bf16.msra.mxu1 %v2652_v31 }
  0x93   :  { %2654 = vmatprep.subr.bf16.mxu1 %v3226_v17 }
  0x96   :  { %2656 = vmatpush1.bf16.msra.mxu1 %v2655_v34 }
  0x97   :  { %2657 = vmatprep.subr.bf16.mxu1 %v3226_v17 }
  0x9a   :  { %2659 = vmatpush1.bf16.msra.mxu1 %v2658_v37 }
  0x9b   :  { %2660 = vmatprep.subr.bf16.mxu1 %v3226_v17 }
  0x9e   :  { %2662 = vmatpush1.bf16.msra.mxu1 %v2661_v40  ;;  %v2691_v40 = vpack.c.bf16 %v613_v36, %v612_v35 }
  0x9f   :  { %2663 = vmatprep.subr.bf16.mxu1 %v3226_v17 }
  0xa2   :  { %2665 = vmatpush1.bf16.msra.mxu1 %v2664_v43  ;;  %v614_v43 = vld [vmem:[#allocation7 + $0x70] sm:$0xff] }
  0xa3   :  { %2666 = vmatprep.subr.bf16.mxu1 %v3226_v17 }
  0xa6   :  { %2668 = vmatpush1.bf16.msra.mxu1 %v2667_v47 }
  0xa7   :  { %2669 = vmatprep.subr.bf16.mxu1 %v3226_v17 }
  0xe2   :  { %v155_v48 = vpop.permute.xlu1 %154 }
  0xe3   :  { %v153_v49 = vpop.permute.xlu0 %152  ;;  %v186_v61 = vsel %vm184_vm2, %v3423_v1, %v155_v48  ;;  %v606_v1 = vld [vmem:[#allocation7 + $0x30] sm:$0xff] }
  0xe4   :  { %v185_v53 = vsel %vm184_vm2, %v3427_v3, %v153_v49  ;;  %v604_v3 = vld [vmem:[#allocation7 + $0x20] sm:$0xff]  ;;  %v2694_v49 = vpack.c.bf16 %v615_v44, %v614_v43 }
  0xe5   :  { %v2679_v7 = vpack.c.bf16 %v605_v4, %v604_v3  ;;  %v622_v3 = vld [vmem:[#allocation7 + $0xb0] sm:$0xf]  ;;  %v283_v4 = vlaneseq }
  0xe6   :  { %v175_v54 = vpop.permute.xlu1 %174 }
  0xe7   :  { %v173_v56 = vpop.permute.xlu0 %172  ;;  %v191_v5 = vsel %vm189_vm3, %v186_v61, %v175_v54  ;;  %v619_v54 = vld [vmem:[#allocation7 + $0x98] sm:$0xff]  ;;  %v621_v61 = vld [vmem:[#allocation7 + $0xa8] sm:$0xff] }
  0xe8   :  { %v190_v59 = vsel %vm189_vm3, %v185_v53, %v173_v56  ;;  %v618_v53 = vld [vmem:[#allocation7 + $0x90] sm:$0xff] }
  0xe9   :  { %2251 = vmatmul.mubr.msk.f32.vlgmr.msra.gmra.mrb[0].mxu0 %vm293_vm4, %v190_v59  ;;  %v2700_v56 = vpack.c.bf16 %v619_v54, %v618_v53  ;;  %v620_v59 = vld [vmem:[#allocation7 + $0xa0] sm:$0xff] }
  0xea   :  { %384 = vmatprep.mubr.f32.mxu0 %v3223_v0  ;;  %2674 = vmatpush1.bf16.msra.mxu0 %v2673_v52  ;;  %v177_v63 = vpop.permute.xlu1 %176 }
  0xeb   :  { %v157_v62 = vpop.permute.xlu0 %156  ;;  %2675 = vmatprep.subr.bf16.mxu0 %v3226_v17 }
  0xec   :  { %v187_v6 = vsel %vm184_vm2, %v3425_v2, %v157_v62  ;;  %v2682_v2 = vpack.c.bf16 %v607_v11, %v606_v1  ;;  %v2703_v62 = vpack.c.bf16 %v621_v61, %v620_v59 }
  0xed   :  { %2252 = vmatmul.mubr.msk.f32.gmra.mrb[2].mxu0 %vm293_vm4, %v191_v5  ;;  %v192_v12 = vsel %vm189_vm3, %v187_v6, %v177_v63  ;;  %v465_v63 = vld [vmem:[#allocation5 + $0xb0] sm:$0xf]  ;;  %v3624_v5 = vshrl.u32 %v283_v4, 7 }
  0xee   :  { %390 = vmatprep.mubr.f32.mxu0 %v3223_v0  ;;  %2677 = vmatpush1.bf16.msra.mxu0 %v2676_v60  ;;  %v225_v9 = vpop.permute.xlu1 %224  ;;  %v2670_v60 = vpack.c.bf16 %v464_v58, %v463_v57  ;;  %v739_v58 = vld [vmem:[%s4509_s5] sm:$0xff] }
  0xef   :  { %v206_v8 = vpop.permute.xlu0 %205  ;;  %2678 = vmatprep.subr.bf16.mxu0 %v3226_v17  ;;  %v285_v6 = vsub.s32 0, %v3624_v5 }
  0xf0   :  { %v236_v13 = vsel %vm184_vm2, %v3447_v15, %v206_v8  ;;  %2671 = vmatpush1.bf16.msra.mxu1 %v2670_v60  ;;  %v289_v8 = vsub.s32 1, %v3624_v5 }
  0xf1   :  { %v240_v14 = vsel %vm189_vm3, %v236_v13, %v225_v9  ;;  %2253 = vmatmul.mubr.msk.f32.gmra.mrb[4].mxu0 %vm293_vm4, %v192_v12  ;;  %539 = vmatprep.subr.mxu1 %v3223_v0 }
  0xf2   :  { %396 = vmatprep.mubr.f32.mxu0 %v3223_v0  ;;  %2680 = vmatpush1.bf16.msra.mxu0 %v2679_v7  ;;  %v179_v18 = vpop.permute.xlu1 %178  ;;  %v248_v21 = vrot.slane %v240_v14, 2  ;;  %v281_v7 = vld [vmem:[%s4537_s1] sm:$0x3] }
  0xf3   :  { %v159_v16 = vpop.permute.xlu0 %158  ;;  %2681 = vmatprep.subr.bf16.mxu0 %v3226_v17  ;;  %v3633_v9 = vrot.slane %v281_v7, %v285_v6  ;;  %v3637_v1 = vrot.slane %v281_v7, %v289_v8 }
  0xf4   :  { %v188_v23 = vsel %vm184_vm2, %v3435_v10, %v159_v16  ;;  %2259 = vmatpush1.msk.msra.mxu1 %vm491_vm5, %v465_v63 }
  0xf5   :  { %v193_v15 = vsel %vm189_vm3, %v188_v23, %v179_v18 }
  0xf6   :  { %v256_v24 = vsel %vm164_vm1, %v193_v15, %v248_v21  ;;  %2683 = vmatpush1.bf16.msra.mxu0 %v2682_v2  ;;  %v227_v27 = vpop.permute.xlu1 %226 }
  0xf7   :  { %2254 = vmatmul.mubr.msk.f32.gmra.mrb[6].mxu0 %vm293_vm4, %v256_v24  ;;  %v208_v26 = vpop.permute.xlu0 %207  ;;  %2684 = vmatprep.subr.bf16.mxu0 %v3226_v17 }
  0xf8   :  { %v237_v30 = vsel %vm184_vm2, %v3459_v22, %v208_v26  ;;  %402 = vmatprep.mubr.f32.mxu0 %v3223_v0 }
  0xf9   :  { %v241_v10 = vsel %vm189_vm3, %v237_v30, %v227_v27 }
  0xfa   :  { %v249_v31 = vrot.slane %v241_v10, 2  ;;  %2686 = vmatpush1.bf16.msra.mxu0 %v2685_v25  ;;  %v229_v34 = vpop.permute.xlu1 %228 }
  0xfb   :  { %v210_v33 = vpop.permute.xlu0 %209  ;;  %2687 = vmatprep.subr.bf16.mxu0 %v3226_v17 }
  0xfc   :  { %v238_v37 = vsel %vm184_vm2, %v3503_v46, %v210_v33  ;;  %v250_v38 = vsel %vm164_vm1, %v248_v21, %v249_v31 }
  0xfd   :  { %v242_v22 = vsel %vm189_vm3, %v238_v37, %v229_v34  ;;  %2255 = vmatmul.mubr.msk.f32.gmra.mrb[8].mxu0 %vm293_vm4, %v250_v38 }
  0xfe   :  { %v251_v39 = vrot.slane %v242_v22, 2  ;;  %408 = vmatprep.mubr.f32.mxu0 %v3223_v0  ;;  %2689 = vmatpush1.bf16.msra.mxu0 %v2688_v32  ;;  %v231_v42 = vpop.permute.xlu1 %230 }
  0xff   :  { %v212_v41 = vpop.permute.xlu0 %211  ;;  %2690 = vmatprep.subr.bf16.mxu0 %v3226_v17 }
 0x100   :  { %v239_v46 = vsel %vm184_vm2, %v3521_v55, %v212_v41  ;;  %v252_v45 = vsel %vm164_vm1, %v249_v31, %v251_v39  ;;  %v2697_v55 = vpack.c.bf16 %v617_v51, %v616_v50 }
 0x101   :  { %v243_v47 = vsel %vm189_vm3, %v239_v46, %v231_v42  ;;  %2256 = vmatmul.mubr.msk.f32.gmra.mrb[10].mxu0 %vm293_vm4, %v252_v45 }
 0x102   :  { %v253_v48 = vrot.slane %v243_v47, 2  ;;  %414 = vmatprep.mubr.f32.mxu0 %v3223_v0  ;;  %2692 = vmatpush1.bf16.msra.mxu0 %v2691_v40 }
 0x103   :  { %2693 = vmatprep.subr.bf16.mxu0 %v3226_v17 }
 0x104   :  { %v254_v52 = vsel %vm164_vm1, %v251_v39, %v253_v48 }
 0x105   :  { %2257 = vmatmul.mubr.msk.f32.gmra.mrb[12].mxu0 %vm293_vm4, %v254_v52 }
 0x106   :  { %420 = vmatprep.mubr.f32.mxu0 %v3223_v0  ;;  %2695 = vmatpush1.bf16.msra.mxu0 %v2694_v49 }
 0x107   :  { %2696 = vmatprep.subr.bf16.mxu0 %v3226_v17 }
 0x109   :  { %2258 = vmatmul.mubr.msk.f32.gmra.mrb[14].mxu0 %vm293_vm4, %v253_v48 }
 0x10a   :  { %2698 = vmatpush1.bf16.msra.mxu0 %v2697_v55 }
 0x10b   :  { %2699 = vmatprep.subr.bf16.mxu0 %v3226_v17 }
 0x10e   :  { %2701 = vmatpush1.bf16.msra.mxu0 %v2700_v56 }
 0x10f   :  { %2702 = vmatprep.subr.bf16.mxu0 %v3226_v17 }
 0x112   :  { %2704 = vmatpush1.bf16.msra.mxu0 %v2703_v62 }
 0x113   :  { %670 = vmatprep.subr.mxu0 %v3223_v0 }
 0x116   :  { %2268 = vmatpush1.msk.msra.mxu0 %vm491_vm5, %v622_v3  ;;  %vm3231_vm5 = vmmov 0  }
 0x1bc   :  { %v380_v11 = vpop.f32.mrb[0].mxu0 }
 0x1bd   :  { %v381_v12 = vadd.f32 %v380_v11, %v3633_v9  ;;  %v382_v13 = vpop.f32.mrb[1].mxu0 }
 0x1be   :  { %v383_v14 = vadd.f32 %v382_v13, %v3637_v1 }
 0x1bf   :  { %v427_v18 = vmax.f32 %v381_v12, 0.0 }
 0x1c0   :  { %v428_v2 = vmax.f32 %v383_v14, 0.0  ;;  %v386_v16 = vpop.f32.mrb[2].mxu0 }
 0x1c1   :  { %v387_v19 = vadd.f32 %v386_v16, %v3633_v9  ;;  %v388_v20 = vpop.f32.mrb[3].mxu0 }
 0x1c2   :  { %v389_v21 = vadd.f32 %v388_v20, %v3637_v1  ;;  %2260 = vmatprep.mubr.msk.f32.mxu1 %vm466_vm6, %v428_v2  ;;  %2269 = vmatprep.mubr.msk.f32.mxu0 %vm466_vm6, %v428_v2 }
 0x1c3   :  { %560 = vmatmul.mubr.f32.vlgmr.msra.gmra.mrb[0].mxu1 %v427_v18  ;;  %691 = vmatmul.mubr.f32.vlgmr.msra.gmra.mrb[16].mxu0 %v427_v18  ;;  %v429_v24 = vmax.f32 %v387_v19, 0.0 }
 0x1c4   :  { %v430_v23 = vmax.f32 %v389_v21, 0.0  ;;  %v392_v15 = vpop.f32.mrb[4].mxu0 }
 0x1c5   :  { %v393_v25 = vadd.f32 %v392_v15, %v3633_v9  ;;  %v394_v26 = vpop.f32.mrb[5].mxu0 }
 0x1c6   :  { %v395_v27 = vadd.f32 %v394_v26, %v3637_v1  ;;  %2261 = vmatprep.mubr.msk.f32.mxu1 %vm466_vm6, %v430_v23  ;;  %2270 = vmatprep.mubr.msk.f32.mxu0 %vm466_vm6, %v430_v23 }
 0x1c7   :  { %565 = vmatmul.mubr.f32.gmra.mrb[2].mxu1 %v429_v24  ;;  %696 = vmatmul.mubr.f32.gmra.mrb[18].mxu0 %v429_v24  ;;  %v431_v29 = vmax.f32 %v393_v25, 0.0 }
 0x1c8   :  { %v432_v28 = vmax.f32 %v395_v27, 0.0 }
 0x1ca   :  { %v398_v30 = vpop.f32.mrb[6].mxu0  ;;  %2262 = vmatprep.mubr.msk.f32.mxu1 %vm466_vm6, %v432_v28  ;;  %2271 = vmatprep.mubr.msk.f32.mxu0 %vm466_vm6, %v432_v28 }
 0x1cb   :  { %v399_v10 = vadd.f32 %v398_v30, %v3633_v9  ;;  %v400_v31 = vpop.f32.mrb[7].mxu0  ;;  %570 = vmatmul.mubr.f32.gmra.mrb[4].mxu1 %v431_v29  ;;  %701 = vmatmul.mubr.f32.gmra.mrb[20].mxu0 %v431_v29 }
 0x1cc   :  { %v401_v32 = vadd.f32 %v400_v31, %v3637_v1 }
 0x1cd   :  { %v433_v34 = vmax.f32 %v399_v10, 0.0 }
 0x1ce   :  { %v434_v33 = vmax.f32 %v401_v32, 0.0 }
 0x1d0   :  { %v404_v35 = vpop.f32.mrb[8].mxu0  ;;  %2263 = vmatprep.mubr.msk.f32.mxu1 %vm466_vm6, %v434_v33  ;;  %2272 = vmatprep.mubr.msk.f32.mxu0 %vm466_vm6, %v434_v33 }
 0x1d1   :  { %v405_v36 = vadd.f32 %v404_v35, %v3633_v9  ;;  %v406_v37 = vpop.f32.mrb[9].mxu0  ;;  %575 = vmatmul.mubr.f32.gmra.mrb[6].mxu1 %v433_v34  ;;  %706 = vmatmul.mubr.f32.gmra.mrb[22].mxu0 %v433_v34 }
 0x1d2   :  { %v407_v38 = vadd.f32 %v406_v37, %v3637_v1 }
 0x1d3   :  { %v435_v40 = vmax.f32 %v405_v36, 0.0 }
 0x1d4   :  { %v436_v22 = vmax.f32 %v407_v38, 0.0  ;;  %v410_v39 = vpop.f32.mrb[10].mxu0 }
 0x1d5   :  { %v411_v41 = vadd.f32 %v410_v39, %v3633_v9  ;;  %v412_v42 = vpop.f32.mrb[11].mxu0 }
 0x1d6   :  { %v413_v43 = vadd.f32 %v412_v42, %v3637_v1  ;;  %2264 = vmatprep.mubr.msk.f32.mxu1 %vm466_vm6, %v436_v22  ;;  %2273 = vmatprep.mubr.msk.f32.mxu0 %vm466_vm6, %v436_v22 }
 0x1d7   :  { %580 = vmatmul.mubr.f32.gmra.mrb[8].mxu1 %v435_v40  ;;  %711 = vmatmul.mubr.f32.gmra.mrb[24].mxu0 %v435_v40  ;;  %v437_v45 = vmax.f32 %v411_v41, 0.0 }
 0x1d8   :  { %v438_v44 = vmax.f32 %v413_v43, 0.0  ;;  %v416_v46 = vpop.f32.mrb[12].mxu0 }
 0x1d9   :  { %v417_v47 = vadd.f32 %v416_v46, %v3633_v9  ;;  %v418_v48 = vpop.f32.mrb[13].mxu0  ;;  %v740_v46 = vld [vmem:[%s4509_s5 + $0x8] sm:$0xff] }
 0x1da   :  { %v419_v49 = vadd.f32 %v418_v48, %v3637_v1  ;;  %2265 = vmatprep.mubr.msk.f32.mxu1 %vm466_vm6, %v438_v44  ;;  %2274 = vmatprep.mubr.msk.f32.mxu0 %vm466_vm6, %v438_v44  ;;  %v844_v48 = vld [vmem:[%s4510_s6] sm:$0xff] }
 0x1db   :  { %585 = vmatmul.mubr.f32.gmra.mrb[10].mxu1 %v437_v45  ;;  %716 = vmatmul.mubr.f32.gmra.mrb[26].mxu0 %v437_v45  ;;  %v439_v52 = vmax.f32 %v417_v47, 0.0  ;;  %v741_v45 = vld [vmem:[%s4509_s5 + $0x10] sm:$0xff]  ;;  %v742_v47 = vld [vmem:[%s4509_s5 + $0x18] sm:$0x3f] }
 0x1dc   :  { %v440_v50 = vmax.f32 %v419_v49, 0.0  ;;  %v422_v51 = vpop.f32.mrb[14].mxu0  ;;  %v845_v49 = vld [vmem:[%s4510_s6 + $0x8] sm:$0xff] }
 0x1dd   :  { %v423_v55 = vadd.f32 %v422_v51, %v3633_v9  ;;  %v424_v53 = vpop.f32.mrb[15].mxu0  ;;  %v847_v51 = vld [vmem:[%s4510_s6 + $0x18] sm:$0x3f] }
 0x1de   :  { %v425_v54 = vadd.f32 %v424_v53, %v3637_v1  ;;  %2266 = vmatprep.mubr.msk.f32.mxu1 %vm466_vm6, %v440_v50  ;;  %2275 = vmatprep.mubr.msk.f32.mxu0 %vm466_vm6, %v440_v50  ;;  %v846_v50 = vld [vmem:[%s4510_s6 + $0x10] sm:$0xff]  ;;  %v1038_v53 = vld [vmem:[%s4511_s7] sm:$0xff]  ;;  %s3228_s6 = smov 52  }
 0x1df   :  { %590 = vmatmul.mubr.f32.gmra.mrb[12].mxu1 %v439_v52  ;;  %721 = vmatmul.mubr.f32.gmra.mrb[28].mxu0 %v439_v52  ;;  %v441_v57 = vmax.f32 %v423_v55, 0.0  ;;  %v1039_v52 = vld [vmem:[%s4511_s7 + $0x8] sm:$0xff]  ;;  %v1041_v55 = vld [vmem:[%s4511_s7 + $0x18] sm:$0xff] }
 0x1e0   :  { %v442_v56 = vmax.f32 %v425_v54, 0.0  ;;  %v2741_v54 = vpack.c.bf16 %v1041_v55, %v1039_v52  ;;  %v1079_v52 = vld [vmem:[%s4511_s7 + $0x148] sm:$0xff]  ;;  %v1081_v55 = vld [vmem:[%s4511_s7 + $0x158] sm:$0xff] }
 0x1e2   :  { %2267 = vmatprep.mubr.msk.f32.mxu1 %vm466_vm6, %v442_v56  ;;  %2276 = vmatprep.mubr.msk.f32.mxu0 %vm466_vm6, %v442_v56  ;;  %v1040_v56 = vld [vmem:[%s4511_s7 + $0x10] sm:$0xff] }
 0x1e3   :  { %595 = vmatmul.mubr.f32.gmra.mrb[14].mxu1 %v441_v57  ;;  %726 = vmatmul.mubr.f32.gmra.mrb[30].mxu0 %v441_v57  ;;  %v1043_v57 = vld [vmem:[%s4511_s7 + $0x28] sm:$0xff] }
 0x1e4   :  { %2476 = vmatprep.mubr.msk.f32.mxu1 %vm743_vm7, %v739_v58  ;;  %v1045_v58 = vld [vmem:[%s4511_s7 + $0x38] sm:$0xff]  ;;  %2742 = vmatprep.subr.bf16.mxu0 %v2741_v54  ;;  %v2781_v54 = vpack.c.bf16 %v1081_v55, %v1079_v52  ;;  %v1103_v55 = vld [vmem:[%s4511_s7 + $0x208] sm:$0xff] }
 0x296   :  { %v561_v59 = vpop.f32.mrb[0].mxu1  ;;  %v692_v60 = vpop.f32.mrb[16].mxu0 }
 0x297   :  { %v731_v61 = vmax.f32 %v561_v59, %v692_v60  ;;  %v563_v62 = vpop.f32.mrb[1].mxu1  ;;  %v694_v63 = vpop.f32.mrb[17].mxu0  ;;  %v2743_v59 = vpack.c.bf16 %v1040_v56, %v1038_v53  ;;  %v2745_v60 = vpack.c.bf16 %v1045_v58, %v1043_v57  ;;  %v1078_v56 = vld [vmem:[%s4511_s7 + $0x140] sm:$0xff]  ;;  %v1080_v57 = vld [vmem:[%s4511_s7 + $0x150] sm:$0xff]  ;;  %v1083_v58 = vld [vmem:[%s4511_s7 + $0x168] sm:$0xff] }
 0x298   :  { %v1044_v62 = vld [vmem:[%s4511_s7 + $0x30] sm:$0xff]  ;;  %v1047_v63 = vld [vmem:[%s4511_s7 + $0x48] sm:$0xff] }
 0x299   :  { %2744 = vmatpush1.bf16.msra.mxu0 %v2743_v59  ;;  %v1085_v59 = vld [vmem:[%s4511_s7 + $0x178] sm:$0xff] }
 0x29a   :  { %v566_v3 = vpop.f32.mrb[2].mxu1  ;;  %v697_v4 = vpop.f32.mrb[18].mxu0  ;;  %2746 = vmatprep.subr.bf16.mxu0 %v2745_v60  ;;  %v2783_v60 = vpack.c.bf16 %v1080_v57, %v1078_v56 }
 0x29b   :  { %v732_v7 = vmax.f32 %v566_v3, %v697_v4  ;;  %v568_v9 = vpop.f32.mrb[3].mxu1  ;;  %v699_v1 = vpop.f32.mrb[19].mxu0  ;;  %v1049_v3 = vld [vmem:[%s4511_s7 + $0x58] sm:$0xff] }
 0x29c   :  { %v1046_v9 = vld [vmem:[%s4511_s7 + $0x40] sm:$0xff]  ;;  %v1048_v1 = vld [vmem:[%s4511_s7 + $0x50] sm:$0xff] }
 0x29d   :  { %v2705_v11 = vpack.c.bf16 %v732_v7, %v731_v61  ;;  %v1042_v61 = vld [vmem:[%s4511_s7 + $0x20] sm:$0xff]  ;;  %v2749_v7 = vpack.c.bf16 %v1049_v3, %v1047_v63  ;;  %v1084_v63 = vld [vmem:[%s4511_s7 + $0x170] sm:$0xff]  ;;  %v1087_v3 = vld [vmem:[%s4511_s7 + $0x188] sm:$0xff] }
 0x29e   :  { %v571_v12 = vpop.f32.mrb[4].mxu1  ;;  %v702_v13 = vpop.f32.mrb[20].mxu0  ;;  %v2747_v4 = vpack.c.bf16 %v1044_v62, %v1042_v61  ;;  %v2785_v61 = vpack.c.bf16 %v1085_v59, %v1083_v58  ;;  %v1082_v62 = vld [vmem:[%s4511_s7 + $0x160] sm:$0xff] }
 0x29f   :  { %v733_v14 = vmax.f32 %v571_v12, %v702_v13  ;;  %v573_v2 = vpop.f32.mrb[5].mxu1  ;;  %v704_v16 = vpop.f32.mrb[21].mxu0  ;;  %2706 = vmatprep.subr.bf16.mxu1 %v2705_v11  ;;  %v1053_v12 = vld [vmem:[%s4511_s7 + $0x78] sm:$0xff]  ;;  %v2751_v13 = vpack.c.bf16 %v1048_v1, %v1046_v9  ;;  %v1086_v1 = vld [vmem:[%s4511_s7 + $0x180] sm:$0xff] }
 0x2a0   :  { %2708 = vmatpush3.bf16.msra.mxu1 %v2705_v11  ;;  %2748 = vmatpush1.bf16.msra.mxu0 %v2747_v4  ;;  %v1050_v2 = vld [vmem:[%s4511_s7 + $0x60] sm:$0xff]  ;;  %v1052_v16 = vld [vmem:[%s4511_s7 + $0x70] sm:$0xff]  ;;  %v1089_v4 = vld [vmem:[%s4511_s7 + $0x198] sm:$0xff] }
 0x2a1   :  { %2750 = vmatprep.subr.bf16.mxu0 %v2749_v7  ;;  %v2787_v7 = vpack.c.bf16 %v1084_v63, %v1082_v62  ;;  %v2789_v9 = vpack.c.bf16 %v1089_v4, %v1087_v3  ;;  %v1322_v62 = vld [vmem:[%s4513_s9 + $0x10] sm:$0xff]  ;;  %v1323_v3 = vld [vmem:[%s4513_s9 + $0x18] sm:$0xff] }
 0x2a2   :  { %v2815_v4 = vpack.c.bf16 %v1323_v3, %v1322_v62 }
 0x2a4   :  { %v576_v18 = vpop.f32.mrb[6].mxu1  ;;  %v707_v19 = vpop.f32.mrb[22].mxu0  ;;  %2752 = vmatpush1.bf16.msra.mxu0 %v2751_v13  ;;  %v1093_v13 = vld [vmem:[%s4511_s7 + $0x1b8] sm:$0xff] }
 0x2a5   :  { %v734_v20 = vmax.f32 %v576_v18, %v707_v19  ;;  %v578_v21 = vpop.f32.mrb[7].mxu1  ;;  %v709_v23 = vpop.f32.mrb[23].mxu0  ;;  %v1055_v18 = vld [vmem:[%s4511_s7 + $0x88] sm:$0xff]  ;;  %v1057_v19 = vld [vmem:[%s4511_s7 + $0x98] sm:$0xff] }
 0x2a6   :  { %v2757_v21 = vpack.c.bf16 %v1057_v19, %v1055_v18  ;;  %v1054_v23 = vld [vmem:[%s4511_s7 + $0x80] sm:$0xff]  ;;  %v1092_v18 = vld [vmem:[%s4511_s7 + $0x1b0] sm:$0xff] }
 0x2a7   :  { %v2709_v15 = vpack.c.bf16 %v734_v20, %v733_v14  ;;  %v2755_v20 = vpack.c.bf16 %v1052_v16, %v1050_v2  ;;  %v1090_v16 = vld [vmem:[%s4511_s7 + $0x1a0] sm:$0xff] }
 0x2a8   :  { %v2795_v19 = vpack.c.bf16 %v1092_v18, %v1090_v16  ;;  %v1330_v18 = vld [vmem:[%s4513_s9 + $0x50] sm:$0xff] }
 0x2a9   :  { %2710 = vmatprep.subr.bf16.mxu1 %v2709_v15 }
 0x2aa   :  { %v581_v24 = vpop.f32.mrb[8].mxu1  ;;  %v712_v25 = vpop.f32.mrb[24].mxu0  ;;  %2712 = vmatpush3.bf16.msra.mxu1 %v2709_v15 }
 0x2ab   :  { %v735_v26 = vmax.f32 %v581_v24, %v712_v25  ;;  %v583_v27 = vpop.f32.mrb[9].mxu1  ;;  %v714_v28 = vpop.f32.mrb[25].mxu0  ;;  %v1059_v24 = vld [vmem:[%s4511_s7 + $0xa8] sm:$0xff]  ;;  %v1061_v25 = vld [vmem:[%s4511_s7 + $0xb8] sm:$0xff] }
 0x2ac   :  { %v2761_v27 = vpack.c.bf16 %v1061_v25, %v1059_v24  ;;  %v1058_v28 = vld [vmem:[%s4511_s7 + $0xa0] sm:$0xff]  ;;  %v1095_v24 = vld [vmem:[%s4511_s7 + $0x1c8] sm:$0xff]  ;;  %v1097_v25 = vld [vmem:[%s4511_s7 + $0x1d8] sm:$0xff] }
 0x2ae   :  { %v586_v29 = vpop.f32.mrb[10].mxu1  ;;  %v717_v30 = vpop.f32.mrb[26].mxu0 }
 0x2af   :  { %v736_v10 = vmax.f32 %v586_v29, %v717_v30  ;;  %v588_v31 = vpop.f32.mrb[11].mxu1  ;;  %v719_v32 = vpop.f32.mrb[27].mxu0  ;;  %v1060_v29 = vld [vmem:[%s4511_s7 + $0xb0] sm:$0xff]  ;;  %v1063_v30 = vld [vmem:[%s4511_s7 + $0xc8] sm:$0xff] }
 0x2b0   :  { %v2763_v31 = vpack.c.bf16 %v1060_v29, %v1058_v28  ;;  %v1096_v28 = vld [vmem:[%s4511_s7 + $0x1d0] sm:$0xff] }
 0x2b1   :  { %v2713_v33 = vpack.c.bf16 %v736_v10, %v735_v26  ;;  %v1065_v10 = vld [vmem:[%s4511_s7 + $0xd8] sm:$0xff] }
 0x2b2   :  { %v591_v34 = vpop.f32.mrb[12].mxu1  ;;  %v722_v35 = vpop.f32.mrb[28].mxu0  ;;  %v2765_v32 = vpack.c.bf16 %v1065_v10, %v1063_v30  ;;  %v1099_v30 = vld [vmem:[%s4511_s7 + $0x1e8] sm:$0xff]  ;;  %v1101_v10 = vld [vmem:[%s4511_s7 + $0x1f8] sm:$0xff] }
 0x2b3   :  { %v737_v36 = vmax.f32 %v591_v34, %v722_v35  ;;  %v593_v37 = vpop.f32.mrb[13].mxu1  ;;  %v724_v38 = vpop.f32.mrb[29].mxu0  ;;  %2714 = vmatprep.subr.bf16.mxu1 %v2713_v33  ;;  %v1064_v34 = vld [vmem:[%s4511_s7 + $0xd0] sm:$0xff]  ;;  %v1067_v35 = vld [vmem:[%s4511_s7 + $0xe8] sm:$0xff] }
 0x2b4   :  { %2716 = vmatpush3.bf16.msra.mxu1 %v2713_v33 }
 0x2b6   :  { %v596_v22 = vpop.f32.mrb[14].mxu1  ;;  %v727_v39 = vpop.f32.mrb[30].mxu0 }
 0x2b7   :  { %v738_v40 = vmax.f32 %v596_v22, %v727_v39  ;;  %v598_v41 = vpop.f32.mrb[15].mxu1  ;;  %v729_v42 = vpop.f32.mrb[31].mxu0  ;;  %v1066_v22 = vld [vmem:[%s4511_s7 + $0xe0] sm:$0xff]  ;;  %v1068_v39 = vld [vmem:[%s4511_s7 + $0xf0] sm:$0xff] }
 0x2b8   :  { %v1073_v41 = vld [vmem:[%s4511_s7 + $0x118] sm:$0xff]  ;;  %v2771_v42 = vpack.c.bf16 %v1068_v39, %v1066_v22 }
 0x2b9   :  { %v2717_v44 = vpack.c.bf16 %v738_v40, %v737_v36  ;;  %v1069_v36 = vld [vmem:[%s4511_s7 + $0xf8] sm:$0xff]  ;;  %v1071_v40 = vld [vmem:[%s4511_s7 + $0x108] sm:$0xff] }
 0x2ba   :  { %v2769_v38 = vpack.c.bf16 %v1069_v36, %v1067_v35  ;;  %v2773_v43 = vpack.c.bf16 %v1073_v41, %v1071_v40 }
 0x2bb   :  { %2719 = vmatprep.subr.msk.bf16.mxu1 %vm3677_vm9, %v2717_v44 }
 0x2bc   :  { %2722 = vmatpush3.bf16.msk.msra.mxu1 %vm3677_vm9, %v2717_v44 }
 0x2bd   :  { %2724 = vmatprep.subr.bf16.mxu1 %v2705_v11 }
 0x2bf   :  { %2477 = vmatmul.mubr.msk.f32.vlgmr.msra.gmra.mrb[16].mxu1 %vm743_vm7, %v740_v46  ;;  %v1072_v46 = vld [vmem:[%s4511_s7 + $0x110] sm:$0xff] }
 0x2c0   :  { %2726 = vmatpush3.bf16.msra.mxu1 %v2705_v11  ;;  %2479 = vmatprep.mubr.msk.f32.mxu1 %vm743_vm7, %v741_v45  ;;  %v1051_v11 = vld [vmem:[%s4511_s7 + $0x68] sm:$0xff] }
 0x2c1   :  { %2728 = vmatprep.subr.bf16.mxu1 %v2709_v15  ;;  %v2753_v14 = vpack.c.bf16 %v1053_v12, %v1051_v11  ;;  %v1075_v45 = vld [vmem:[%s4511_s7 + $0x128] sm:$0xff]  ;;  %v1088_v11 = vld [vmem:[%s4511_s7 + $0x190] sm:$0xff] }
 0x2c2   :  { %v1091_v12 = vld [vmem:[%s4511_s7 + $0x1a8] sm:$0xff] }
 0x2c3   :  { %2480 = vmatmul.mubr.msk.f32.gmra.mrb[18].mxu1 %vm743_vm7, %v742_v47  ;;  %2754 = vmatprep.subr.bf16.mxu0 %v2753_v14  ;;  %v1077_v47 = vld [vmem:[%s4511_s7 + $0x138] sm:$0xff]  ;;  %v2791_v14 = vpack.c.bf16 %v1088_v11, %v1086_v1  ;;  %v2793_v2 = vpack.c.bf16 %v1093_v13, %v1091_v12  ;;  %v1326_v11 = vld [vmem:[%s4513_s9 + $0x30] sm:$0xff] }
 0x2c4   :  { %2730 = vmatpush3.bf16.msra.mxu1 %v2709_v15  ;;  %2498 = vmatprep.mubr.msk.f32.mxu1 %vm743_vm7, %v844_v48  ;;  %v1056_v15 = vld [vmem:[%s4511_s7 + $0x90] sm:$0xff]  ;;  %v1327_v12 = vld [vmem:[%s4513_s9 + $0x38] sm:$0xff] }
 0x2c5   :  { %2732 = vmatprep.subr.bf16.mxu1 %v2713_v33  ;;  %2756 = vmatpush1.bf16.msra.mxu0 %v2755_v20  ;;  %v2759_v26 = vpack.c.bf16 %v1056_v15, %v1054_v23  ;;  %v2821_v13 = vpack.c.bf16 %v1327_v12, %v1326_v11 }
 0x2c6   :  { %2758 = vmatprep.subr.bf16.mxu0 %v2757_v21 }
 0x2c8   :  { %2734 = vmatpush3.bf16.msra.mxu1 %v2713_v33  ;;  %v1062_v33 = vld [vmem:[%s4511_s7 + $0xc0] sm:$0xff] }
 0x2c9   :  { %2737 = vmatprep.subr.msk.bf16.mxu1 %vm3677_vm9, %v2717_v44  ;;  %2760 = vmatpush1.bf16.msra.mxu0 %v2759_v26  ;;  %v2767_v37 = vpack.c.bf16 %v1064_v34, %v1062_v33  ;;  %v2797_v26 = vpack.c.bf16 %v1097_v25, %v1095_v24  ;;  %v1100_v33 = vld [vmem:[%s4511_s7 + $0x1f0] sm:$0xff]  ;;  %v1335_v25 = vld [vmem:[%s4513_s9 + $0x78] sm:$0xff] }
 0x2ca   :  { %2762 = vmatprep.subr.bf16.mxu0 %v2761_v27  ;;  %v1094_v27 = vld [vmem:[%s4511_s7 + $0x1c0] sm:$0xff]  ;;  %v1334_v24 = vld [vmem:[%s4513_s9 + $0x70] sm:$0xff] }
 0x2cb   :  { %v2799_v29 = vpack.c.bf16 %v1096_v28, %v1094_v27  ;;  %v1336_v27 = vld [vmem:[%s4513_s9 + $0x80] sm:$0xff]  ;;  %v1337_v28 = vld [vmem:[%s4513_s9 + $0x88] sm:$0xff] }
 0x2cc   :  { %2740 = vmatpush3.bf16.msk.msra.mxu1 %vm3677_vm9, %v2717_v44  ;;  %v1070_v44 = vld [vmem:[%s4511_s7 + $0x100] sm:$0xff] }
 0x2cd   :  { %2811 = vmatprep.subr.bf16.mxu1 %v3226_v17  ;;  %2764 = vmatpush1.bf16.msra.mxu0 %v2763_v31  ;;  %v2775_v48 = vpack.c.bf16 %v1072_v46, %v1070_v44  ;;  %v2801_v31 = vpack.c.bf16 %v1101_v10, %v1099_v30  ;;  %v1338_v30 = vld [vmem:[%s4513_s9 + $0x90] sm:$0xff]  ;;  %v1339_v10 = vld [vmem:[%s4513_s9 + $0x98] sm:$0xff] }
 0x2ce   :  { %2766 = vmatprep.subr.bf16.mxu0 %v2765_v32  ;;  %v1098_v32 = vld [vmem:[%s4511_s7 + $0x1e0] sm:$0xff] }
 0x2cf   :  { %2499 = vmatmul.mubr.msk.f32.vlgmr.msra.gmra.mrb[20].mxu1 %vm743_vm7, %v845_v49  ;;  %v2777_v49 = vpack.c.bf16 %v1077_v47, %v1075_v45  ;;  %v2803_v34 = vpack.c.bf16 %v1100_v33, %v1098_v32  ;;  %v1340_v32 = vld [vmem:[%s4513_s9 + $0xa0] sm:$0xff]  ;;  %v1341_v33 = vld [vmem:[%s4513_s9 + $0xa8] sm:$0xff] }
 0x2d0   :  { %2501 = vmatprep.mubr.msk.f32.mxu1 %vm743_vm7, %v846_v50  ;;  %v1074_v50 = vld [vmem:[%s4511_s7 + $0x120] sm:$0xff] }
 0x2d1   :  { %2768 = vmatpush1.bf16.msra.mxu0 %v2767_v37 }
 0x2d2   :  { %2770 = vmatprep.subr.bf16.mxu0 %v2769_v38 }
 0x2d3   :  { %2502 = vmatmul.mubr.msk.f32.gmra.mrb[22].mxu1 %vm743_vm7, %v847_v51  ;;  %v1076_v51 = vld [vmem:[%s4511_s7 + $0x130] sm:$0xff] }
 0x2d4   :  { %v2779_v53 = vpack.c.bf16 %v1076_v51, %v1074_v50 }
 0x2d5   :  { %2772 = vmatpush1.bf16.msra.mxu0 %v2771_v42 }
 0x2d6   :  { %2774 = vmatprep.subr.bf16.mxu0 %v2773_v43 }
 0x2d9   :  { %2776 = vmatpush1.bf16.msra.mxu0 %v2775_v48 }
 0x2da   :  { %2778 = vmatprep.subr.bf16.mxu0 %v2777_v49 }
 0x2dd   :  { %2780 = vmatpush1.bf16.msra.mxu0 %v2779_v53  ;;  %v1105_v53 = vld [vmem:[%s4511_s7 + $0x218] sm:$0x3f] }
 0x2de   :  { %2782 = vmatprep.subr.bf16.mxu0 %v2781_v54  ;;  %v2805_v56 = vpack.c.bf16 %v1105_v53, %v1103_v55 }
 0x2e1   :  { %2784 = vmatpush1.bf16.msra.mxu0 %v2783_v60  ;;  %v1320_v60 = vld [vmem:[%s4513_s9] sm:$0xff] }
 0x2e2   :  { %2786 = vmatprep.subr.bf16.mxu0 %v2785_v61  ;;  %v1321_v61 = vld [vmem:[%s4513_s9 + $0x8] sm:$0xff] }
 0x2e3   :  { %v2812_v63 = vpack.c.bf16 %v1321_v61, %v1320_v60 }
 0x2e5   :  { %2788 = vmatpush1.bf16.msra.mxu0 %v2787_v7  ;;  %2813 = vmatpush1.bf16.msra.mxu1 %v2812_v63  ;;  %v1324_v7 = vld [vmem:[%s4513_s9 + $0x20] sm:$0xff] }
 0x2e6   :  { %2790 = vmatprep.subr.bf16.mxu0 %v2789_v9  ;;  %2814 = vmatprep.subr.bf16.mxu1 %v3226_v17  ;;  %v1325_v9 = vld [vmem:[%s4513_s9 + $0x28] sm:$0xff] }
 0x2e7   :  { %v2818_v1 = vpack.c.bf16 %v1325_v9, %v1324_v7 }
 0x2e9   :  { %2792 = vmatpush1.bf16.msra.mxu0 %v2791_v14  ;;  %2816 = vmatpush1.bf16.msra.mxu1 %v2815_v4  ;;  %v1328_v14 = vld [vmem:[%s4513_s9 + $0x40] sm:$0xff] }
 0x2ea   :  { %2794 = vmatprep.subr.bf16.mxu0 %v2793_v2  ;;  %2817 = vmatprep.subr.bf16.mxu1 %v3226_v17  ;;  %v1329_v2 = vld [vmem:[%s4513_s9 + $0x48] sm:$0xff] }
 0x2eb   :  { %v2824_v16 = vpack.c.bf16 %v1329_v2, %v1328_v14 }
 0x2ed   :  { %2796 = vmatpush1.bf16.msra.mxu0 %v2795_v19  ;;  %2819 = vmatpush1.bf16.msra.mxu1 %v2818_v1  ;;  %v1331_v19 = vld [vmem:[%s4513_s9 + $0x58] sm:$0xff] }
 0x2ee   :  { %2798 = vmatprep.subr.bf16.mxu0 %v2797_v26  ;;  %2820 = vmatprep.subr.bf16.mxu1 %v3226_v17  ;;  %v2833_v26 = vpack.c.bf16 %v1335_v25, %v1334_v24  ;;  %v1345_v24 = vld [vmem:[%s4513_s9 + $0xc8] sm:$0xff] }
 0x2f1   :  { %2800 = vmatpush1.bf16.msra.mxu0 %v2799_v29  ;;  %2822 = vmatpush1.bf16.msra.mxu1 %v2821_v13  ;;  %v2836_v29 = vpack.c.bf16 %v1337_v28, %v1336_v27 }
 0x2f2   :  { %2802 = vmatprep.subr.bf16.mxu0 %v2801_v31  ;;  %2823 = vmatprep.subr.bf16.mxu1 %v3226_v17  ;;  %v2839_v31 = vpack.c.bf16 %v1339_v10, %v1338_v30 }
 0x2f5   :  { %2804 = vmatpush1.bf16.msra.mxu0 %v2803_v34  ;;  %2825 = vmatpush1.bf16.msra.mxu1 %v2824_v16  ;;  %v2842_v34 = vpack.c.bf16 %v1341_v33, %v1340_v32  ;;  %v1445_v32 = vld [vmem:[%s4514_s10 + $0x8] sm:$0xff] }
 0x2f6   :  { %2807 = vmatprep.subr.msk.bf16.mxu0 %vm3936_vm10, %v2805_v56  ;;  %2826 = vmatprep.subr.bf16.mxu1 %v3226_v17 }
 0x392   :  { %v2478_v20 = vpop.f32.mrb[16].mxu1 }
 0x393   :  { %v825_v21 = vpop.f32.mrb[17].mxu1 }
 0x396   :  { %v2481_v23 = vpop.f32.mrb[18].mxu1 }
 0x397   :  { %v835_v15 = vpop.f32.mrb[19].mxu1 }
 0x3a2   :  { %v2500_v35 = vpop.f32.mrb[20].mxu1 }
 0x3a3   :  { %v3910_v36 = vmax.f32 %v2478_v20, %v2500_v35  ;;  %v926_v37 = vpop.f32.mrb[21].mxu1  ;;  %v2827_v20 = vpack.c.bf16 %v1331_v19, %v1330_v18  ;;  %v1342_v35 = vld [vmem:[%s4513_s9 + $0xb0] sm:$0xff] }
 0x3a4   :  { %v3912_v38 = vmax.f32 %v825_v21, %v926_v37  ;;  %v1332_v21 = vld [vmem:[%s4513_s9 + $0x60] sm:$0xff]  ;;  %v1343_v37 = vld [vmem:[%s4513_s9 + $0xb8] sm:$0xff] }
 0x3a5   :  { %v961_v22 = vrot.slane %v3910_v36, 2  ;;  %v952_v41 = vrot.slane %v3910_v36, 1  ;;  %2828 = vmatpush1.bf16.msra.mxu1 %v2827_v20 }
 0x3a6   :  { %v960_v39 = vrot.slane %v3912_v38, 2  ;;  %v2503_v40 = vpop.f32.mrb[22].mxu1  ;;  %v951_v42 = vrot.slane %v3912_v38, 1  ;;  %2829 = vmatprep.subr.bf16.mxu1 %v3226_v17 }
 0x3a7   :  { %v3918_v43 = vmax.f32 %v2481_v23, %v2503_v40  ;;  %v936_v44 = vpop.f32.mrb[23].mxu1  ;;  %v1333_v23 = vld [vmem:[%s4513_s9 + $0x68] sm:$0xff]  ;;  %v1102_v40 = vld [vmem:[%s4511_s7 + $0x200] sm:$0xff] }
 0x3a8   :  { %v3920_v46 = vmax.f32 %v835_v15, %v936_v44  ;;  %v962_v45 = vsel %vm164_vm1, %v960_v39, %v961_v22  ;;  %v953_v50 = vsel %vm144_vm0, %v951_v42, %v952_v41  ;;  %v2830_v15 = vpack.c.bf16 %v1333_v23, %v1332_v21 }
 0x3a9   :  { %v977_v47 = vrot.slane %v3918_v43, 1  ;;  %963 = vrot.lane.b32.xlu1 %v962_v45, %s3228_s6  ;;  %v989_v58 = vrot.slane %v3918_v43, 2 }
 0x3aa   :  { %v976_v48 = vrot.slane %v3920_v46, 1  ;;  %v988_v49 = vrot.slane %v3920_v46, 2  ;;  %2831 = vmatpush1.bf16.msra.mxu1 %v2830_v15  ;;  %v1344_v15 = vld [vmem:[%s4513_s9 + $0xc0] sm:$0xff] }
 0x3ab   :  { %2832 = vmatprep.subr.bf16.mxu1 %v3226_v17  ;;  %v2848_v25 = vpack.c.bf16 %v1345_v24, %v1344_v15  ;;  %v1466_v24 = vld [vmem:[%s4514_s10 + $0xb0] sm:$0xff] }
 0x3ac   :  { %v3066_v51 = vpack.i.bf16 %v976_v48, %v953_v50  ;;  %v978_v52 = vsel %vm144_vm0, %v976_v48, %v977_v47  ;;  %v990_v59 = vsel %vm164_vm1, %v988_v49, %v989_v58  ;;  %vm1568_vm0 = vcmask 1041408  }
 0x3ad   :  { %991 = vrot.lane.b32.xlu1 %v988_v49, %s3228_s6  ;;  %v3071_v57 = vpack.i.bf16 %v952_v41, %v978_v52  ;;  %v1104_v41 = vld [vmem:[%s4511_s7 + $0x210] sm:$0x3f] }
 0x3ae   :  { %3067 = vrot.lane.b32.xlu0 %v3066_v51, %s3229_s20  ;;  %2834 = vmatpush1.bf16.msra.mxu1 %v2833_v26  ;;  %v2808_v48 = vpack.c.bf16 %v1104_v41, %v1102_v40  ;;  %v1106_v26 = vld [vmem:[%s4512_s8] sm:$0x3] }
 0x3af   :  { %2835 = vmatprep.subr.bf16.mxu1 %v3226_v17  ;;  %v1111_v27 = vrot.slane %v1106_v26, %v285_v6  ;;  %v1115_v28 = vrot.slane %v1106_v26, %v289_v8 }
 0x3b1   :  { %965 = vrot.lane.b32.xlu1 %v961_v22, %s3228_s6  ;;  %v2845_v22 = vpack.c.bf16 %v1343_v37, %v1342_v35 }
 0x3b2   :  { %3072 = vrot.lane.b32.xlu0 %v3071_v57, %s3229_s20  ;;  %2837 = vmatpush1.bf16.msra.mxu1 %v2836_v29 }
 0x3b3   :  { %2838 = vmatprep.subr.bf16.mxu1 %v3226_v17 }
 0x3b5   :  { %995 = vrot.lane.b32.xlu1 %v989_v58, %s3228_s6 }
 0x3b6   :  { %993 = vrot.lane.b32.xlu0 %v990_v59, %s3228_s6  ;;  %2840 = vmatpush1.bf16.msra.mxu1 %v2839_v31  ;;  %v1444_v31 = vld [vmem:[%s4514_s10] sm:$0xff] }
 0x3b7   :  { %2841 = vmatprep.subr.bf16.mxu1 %v3226_v17  ;;  %v2851_v6 = vpack.c.bf16 %v1445_v32, %v1444_v31 }
 0x3ba   :  { %983 = vrot.lane.b32.xlu0 %v977_v47, %s3229_s20  ;;  %2843 = vmatpush1.bf16.msra.mxu1 %v2842_v34 }
 0x3bb   :  { %2844 = vmatprep.subr.bf16.mxu1 %v3226_v17 }
 0x3be   :  { %2846 = vmatpush1.bf16.msra.mxu1 %v2845_v22  ;;  %v1446_v22 = vld [vmem:[%s4514_s10 + $0x10] sm:$0xff] }
 0x3bf   :  { %2847 = vmatprep.subr.bf16.mxu1 %v3226_v17 }
 0x3c2   :  { %2849 = vmatpush1.bf16.msra.mxu1 %v2848_v25  ;;  %v1467_v25 = vld [vmem:[%s4514_s10 + $0xb8] sm:$0xff] }
 0x3c3   :  { %2850 = vmatprep.subr.bf16.mxu1 %v3226_v17  ;;  %v2884_v26 = vpack.c.bf16 %v1467_v25, %v1466_v24  ;;  %v1777_v24 = vld [vmem:[%s4517_s13 + $0xb8] sm:$0xff] }
 0x41b   :  { %v964_v39 = vpop.permute.xlu1 %963 }
 0x41f   :  { %v992_v42 = vpop.permute.xlu1 %991 }
 0x420   :  { %v3068_v44 = vpop.permute.xlu0 %3067  ;;  %v1018_v19 = vrot.slane %v992_v42, 2 }
 0x421   :  { %v3069_v45 = vunpack.i.l.bf16 %v3068_v44  ;;  %v3070_v47 = vunpack.i.h.bf16 %v3068_v44 }
 0x423   :  { %v972_v49 = vsel %vm466_vm6, %v3069_v45, %v964_v39  ;;  %v970_v50 = vsel %vm969_vm11, %v3912_v38, %v3069_v45  ;;  %v1000_v55 = vsel %vm969_vm11, %v3910_v36, %v3070_v47  ;;  %v966_v53 = vpop.permute.xlu1 %965  ;;  %v1003_v56 = vsel %vm466_vm6, %v3070_v47, %v992_v42 }
 0x424   :  { %1198 = vmatprep.mubr.f32.mxu0 %v972_v49  ;;  %v3073_v51 = vpop.permute.xlu0 %3072  ;;  %v1012_v38 = vrot.slane %v1000_v55, 2  ;;  %v1015_v62 = vrot.slane %v1003_v56, 2  ;;  %v1448_v49 = vld [vmem:[%s4514_s10 + $0x20] sm:$0xff] }
 0x425   :  { %v3074_v52 = vunpack.i.l.bf16 %v3073_v51  ;;  %1199 = vmatmul.mubr.f32.vlgmr.msra.gmra.mrb[32].mxu0 %v970_v50  ;;  %v3075_v58 = vunpack.i.h.bf16 %v3073_v51  ;;  %v1449_v50 = vld [vmem:[%s4514_s10 + $0x28] sm:$0xff] }
 0x426   :  { %2810 = vmatpush1.bf16.msk.msra.mxu0 %vm3936_vm10, %v2808_v48 }
 0x427   :  { %v1001_v57 = vsel %vm969_vm11, %v3920_v46, %v3074_v52  ;;  %v996_v4 = vpop.permute.xlu1 %995  ;;  %v973_v54 = vsel %vm466_vm6, %v3075_v58, %v966_v53  ;;  %v971_v12 = vsel %vm969_vm11, %v3910_v36, %v3075_v58 }
 0x428   :  { %v1013_v59 = vrot.slane %v1001_v57, 2  ;;  %v994_v60 = vpop.permute.xlu0 %993  ;;  %v1025_v20 = vrot.slane %v996_v4, 2 }
 0x429   :  { %v1004_v61 = vsel %vm466_vm6, %v3074_v52, %v994_v60 }
 0x42a   :  { %v1016_v63 = vrot.slane %v1004_v61, 2  ;;  %v1014_v3 = vsel %vm164_vm1, %v1012_v38, %v1013_v59 }
 0x42b   :  { %v1035_v2 = vsel %vm1034_vm12, %v971_v12, %v1014_v3  ;;  %v1452_v3 = vld [vmem:[%s4514_s10 + $0x40] sm:$0xff] }
 0x42c   :  { %v984_v7 = vpop.permute.xlu0 %983  ;;  %v1017_v9 = vsel %vm164_vm1, %v1015_v62, %v1016_v63 }
 0x42d   :  { %v1002_v46 = vsel %vm969_vm11, %v3918_v43, %v984_v7  ;;  %v1005_v1 = vsel %vm466_vm6, %v984_v7, %v996_v4  ;;  %v1036_v11 = vsel %vm1034_vm12, %v973_v54, %v1017_v9  ;;  %v1019_v43 = vrot.slane %v994_v60, 2  ;;  %v1451_v60 = vld [vmem:[%s4514_s10 + $0x38] sm:$0xff]  ;;  %v1453_v4 = vld [vmem:[%s4514_s10 + $0x48] sm:$0xff]  ;;  %v1454_v54 = vld [vmem:[%s4514_s10 + $0x50] sm:$0xff] }
 0x42e   :  { %v1021_v13 = vrot.slane %v1002_v46, 2  ;;  %v1023_v14 = vrot.slane %v1005_v1, 2  ;;  %1204 = vmatprep.mubr.f32.mxu0 %v1036_v11  ;;  %v2863_v7 = vpack.c.bf16 %v1453_v4, %v1452_v3  ;;  %v1455_v9 = vld [vmem:[%s4514_s10 + $0x58] sm:$0xff]  ;;  %v1456_v1 = vld [vmem:[%s4514_s10 + $0x60] sm:$0xff]  ;;  %v1457_v11 = vld [vmem:[%s4514_s10 + $0x68] sm:$0xff] }
 0x42f   :  { %1205 = vmatmul.mubr.f32.gmra.mrb[34].mxu0 %v1035_v2  ;;  %v1020_v36 = vsel %vm164_vm1, %v1018_v19, %v1019_v43  ;;  %v1026_v23 = vsel %vm164_vm1, %v1019_v43, %v1025_v20  ;;  %v2866_v46 = vpack.c.bf16 %v1455_v9, %v1454_v54  ;;  %v2869_v12 = vpack.c.bf16 %v1457_v11, %v1456_v1  ;;  %v1462_v19 = vld [vmem:[%s4514_s10 + $0x90] sm:$0xff]  ;;  %v1757_v4 = vld [vmem:[%s4517_s13 + $0x18] sm:$0xff]  ;;  %v1803_v54 = vld [vmem:[%s4517_s13 + $0x188] sm:$0xff] }
 0x430   :  { %v1024_v16 = vsel %vm164_vm1, %v1016_v63, %v1023_v14  ;;  %v1022_v18 = vsel %vm164_vm1, %v1013_v59, %v1021_v13  ;;  %v1037_v21 = vsel %vm1034_vm12, %v966_v53, %v1020_v36  ;;  %v2857_v53 = vpack.c.bf16 %v1449_v50, %v1448_v49  ;;  %v1450_v59 = vld [vmem:[%s4514_s10 + $0x30] sm:$0xff]  ;;  %v1463_v36 = vld [vmem:[%s4514_s10 + $0x98] sm:$0xff]  ;;  %vm2894_vm1 = vmpackc.low %vm1568_vm0, %vm3227_vm8 }
 0x431   :  { %1210 = vmatprep.mubr.f32.mxu0 %v1024_v16  ;;  %v2860_v62 = vpack.c.bf16 %v1451_v60, %v1450_v59  ;;  %v1460_v16 = vld [vmem:[%s4514_s10 + $0x80] sm:$0xff]  ;;  %v1755_v60 = vld [vmem:[%s4517_s13 + $0x8] sm:$0xff]  ;;  %v1756_v3 = vld [vmem:[%s4517_s13 + $0x10] sm:$0xff] }
 0x432   :  { %v1786_v9 = vld [vmem:[%s4517_s13 + $0x100] sm:$0xff]  ;;  %v2915_v1 = vpack.c.bf16 %v1757_v4, %v1756_v3  ;;  %v1796_v4 = vld [vmem:[%s4517_s13 + $0x150] sm:$0xff] }
 0x433   :  { %1211 = vmatmul.mubr.f32.gmra.mrb[36].mxu0 %v1022_v18  ;;  %v1461_v18 = vld [vmem:[%s4514_s10 + $0x88] sm:$0xff] }
 0x434   :  { %1216 = vmatprep.mubr.f32.mxu0 %v1023_v14  ;;  %v1459_v14 = vld [vmem:[%s4514_s10 + $0x78] sm:$0xff]  ;;  %v2875_v43 = vpack.c.bf16 %v1461_v18, %v1460_v16  ;;  %v1759_v18 = vld [vmem:[%s4517_s13 + $0x28] sm:$0xff] }
 0x437   :  { %1217 = vmatmul.mubr.f32.gmra.mrb[38].mxu0 %v1021_v13  ;;  %v1458_v13 = vld [vmem:[%s4514_s10 + $0x70] sm:$0xff] }
 0x438   :  { %1287 = vmatprep.mubr.f32.mxu0 %v3223_v0  ;;  %v2872_v2 = vpack.c.bf16 %v1459_v14, %v1458_v13  ;;  %v1774_v13 = vld [vmem:[%s4517_s13 + $0xa0] sm:$0xff]  ;;  %v1775_v14 = vld [vmem:[%s4517_s13 + $0xa8] sm:$0xff] }
 0x439   :  { %v2917_v16 = vpack.c.bf16 %v1775_v14, %v1774_v13 }
 0x43b   :  { %2289 = vmatmul.mubr.msk.f32.vlgmr.msra.gmra.mrb[32].mxu0 %vm1118_vm13, %v964_v39  ;;  %v1447_v39 = vld [vmem:[%s4514_s10 + $0x18] sm:$0xff] }
 0x43c   :  { %1293 = vmatprep.mubr.f32.mxu0 %v3223_v0  ;;  %v2854_v44 = vpack.c.bf16 %v1447_v39, %v1446_v22 }
 0x43f   :  { %2290 = vmatmul.mubr.msk.f32.gmra.mrb[34].mxu0 %vm1118_vm13, %v1037_v21  ;;  %v1464_v21 = vld [vmem:[%s4514_s10 + $0xa0] sm:$0xff] }
 0x440   :  { %1299 = vmatprep.mubr.f32.mxu0 %v3223_v0 }
 0x443   :  { %2291 = vmatmul.mubr.msk.f32.gmra.mrb[36].mxu0 %vm1118_vm13, %v1026_v23  ;;  %v1465_v23 = vld [vmem:[%s4514_s10 + $0xa8] sm:$0xff] }
 0x444   :  { %1305 = vmatprep.mubr.f32.mxu0 %v3223_v0  ;;  %v2881_v15 = vpack.c.bf16 %v1465_v23, %v1464_v21  ;;  %v1789_v21 = vld [vmem:[%s4517_s13 + $0x118] sm:$0xff]  ;;  %v1776_v23 = vld [vmem:[%s4517_s13 + $0xb0] sm:$0xff] }
 0x447   :  { %2292 = vmatmul.mubr.msk.f32.gmra.mrb[38].mxu0 %vm1118_vm13, %v1025_v20  ;;  %v2878_v20 = vpack.c.bf16 %v1463_v36, %v1462_v19  ;;  %v1805_v19 = vld [vmem:[%s4517_s13 + $0x198] sm:$0xff] }
 0x50e   :  { %v1289_v29 = vpop.f32.mrb[32].mxu0 }
 0x50f   :  { %v4078_v30 = vadd.f32 %v1289_v29, %v1111_v27  ;;  %v1291_v10 = vpop.f32.mrb[33].mxu0 }
 0x510   :  { %v3034_v33 = vadd.f32 %v1291_v10, %v1115_v28 }
 0x511   :  { %v1312_v5 = vmax.f32 %v4078_v30, 0.0  ;;  %v1559_v30 = vld [vmem:[%s4515_s11] sm:$0xff] }
 0x512   :  { %v1313_v34 = vmax.f32 %v3034_v33, 0.0  ;;  %v1295_v35 = vpop.f32.mrb[34].mxu0  ;;  %2512 = vmatprep.mubr.msk.f32.mxu0 %vm1561_vm15, %v1559_v30  ;;  %v1760_v30 = vld [vmem:[%s4517_s13 + $0x30] sm:$0xff] }
 0x513   :  { %v4087_v8 = vadd.f32 %v1295_v35, %v1111_v27  ;;  %v1297_v37 = vpop.f32.mrb[35].mxu0 }
 0x514   :  { %v4095_v40 = vadd.f32 %v1297_v37, %v1115_v28  ;;  %2293 = vmatprep.mubr.msk.f32.mxu1 %vm1346_vm14, %v1313_v34 }
 0x515   :  { %1424 = vmatmul.mubr.f32.vlgmr.msra.gmra.mrb[24].mxu1 %v1312_v5  ;;  %v1314_v45 = vmax.f32 %v4087_v8, 0.0 }
 0x516   :  { %v1315_v41 = vmax.f32 %v4095_v40, 0.0  ;;  %2852 = vmatpush1.bf16.msra.mxu1 %v2851_v6  ;;  %v1301_v42 = vpop.f32.mrb[36].mxu0 }
 0x517   :  { %v4102_v47 = vadd.f32 %v1301_v42, %v1111_v27  ;;  %v1303_v48 = vpop.f32.mrb[37].mxu0  ;;  %2853 = vmatprep.subr.bf16.mxu1 %v3226_v17 }
 0x518   :  { %v4111_v51 = vadd.f32 %v1303_v48, %v1115_v28  ;;  %2294 = vmatprep.mubr.msk.f32.mxu1 %vm1346_vm14, %v1315_v41 }
 0x519   :  { %1429 = vmatmul.mubr.f32.gmra.mrb[26].mxu1 %v1314_v45  ;;  %v1316_v56 = vmax.f32 %v4102_v47, 0.0 }
 0x51a   :  { %v1317_v52 = vmax.f32 %v4111_v51, 0.0  ;;  %2855 = vmatpush1.bf16.msra.mxu1 %v2854_v44  ;;  %v1307_v55 = vpop.f32.mrb[38].mxu0 }
 0x51b   :  { %v4120_v57 = vadd.f32 %v1307_v55, %v1111_v27  ;;  %v1309_v58 = vpop.f32.mrb[39].mxu0  ;;  %2856 = vmatprep.subr.bf16.mxu1 %v3226_v17  ;;  %v1468_v27 = vld [vmem:[%s4514_s10 + $0xc0] sm:$0xff] }
 0x51c   :  { %v4129_v38 = vadd.f32 %v1309_v58, %v1115_v28  ;;  %2295 = vmatprep.mubr.msk.f32.mxu1 %vm1346_vm14, %v1317_v52  ;;  %v1469_v28 = vld [vmem:[%s4514_s10 + $0xc8] sm:$0xff]  ;;  %v1647_v55 = vld [vmem:[%s4516_s12] sm:$0xff]  ;;  %s3232_s10 = smov [#allocation11]  }
 0x51d   :  { %1434 = vmatmul.mubr.f32.gmra.mrb[28].mxu1 %v1316_v56  ;;  %v1318_v63 = vmax.f32 %v4120_v57, 0.0  ;;  %v2887_v29 = vpack.c.bf16 %v1469_v28, %v1468_v27  ;;  %v1771_v57 = vld [vmem:[%s4517_s13 + $0x88] sm:$0xff]  ;;  %v1754_v58 = vld [vmem:[%s4517_s13] sm:$0xff]  ;;  %s2240_s5 = sshll.u32 %s3232_s10, 4  ;;  %s2241_s5 = int_to_ptr.vmem [resolvable:$true] %s2240_s5 }
 0x51e   :  { %v1319_v61 = vmax.f32 %v4129_v38, 0.0  ;;  %2858 = vmatpush1.bf16.msra.mxu1 %v2857_v53  ;;  %v1648_v53 = vld [vmem:[%s4516_s12 + $0x8] sm:$0xf]  ;;  %v1772_v38 = vld [vmem:[%s4517_s13 + $0x90] sm:$0xff]  ;;  %v1790_v28 = vld [vmem:[%s4517_s13 + $0x120] sm:$0xff]  ;;  %s3186_s30 = scalar_lea.vmem %s2241_s5, 32  ;;  %p3191_p13 = scmp.lt.s32.totalorder %s2241_s5, %s2241_s5 }
 0x51f   :  { %2859 = vmatprep.subr.bf16.mxu1 %v3226_v17  ;;  %v1807_v27 = vld [vmem:[%s4517_s13 + $0x1a8] sm:$0xff]  ;;  %p3187_p12 = scmp.ne.s32.totalorder %s2241_s5, %s3186_s30  ;;  %p3192_p0 = scmp.lt.s32.totalorder %s3186_s30, %s3186_s30 }
 0x520   :  { %2296 = vmatprep.mubr.msk.f32.mxu1 %vm1346_vm14, %v1319_v61 }
 0x521   :  { %1439 = vmatmul.mubr.f32.gmra.mrb[30].mxu1 %v1318_v63  ;;  %p3193_p1 = por %p3192_p0, %p3191_p13 }
 0x522   :  { %2861 = vmatpush1.bf16.msra.mxu1 %v2860_v62  ;;  %2297 = vmatprep.mubr.msk.f32.mxu1 %vm1346_vm14, %v1313_v34  ;;  %v2911_v62 = vpack.c.bf16 %v1755_v60, %v1754_v58  ;;  %v1812_v58 = vld [vmem:[%s4517_s13 + $0x1d0] sm:$0xff]  ;;  %v1782_v60 = vld [vmem:[%s4517_s13 + $0xe0] sm:$0xff] }
 0x523   :  { %2862 = vmatprep.subr.bf16.mxu1 %v3226_v17  ;;  %p3194_p2 = pnand %p3193_p1, %p3187_p12 }
 0x526   :  { %2864 = vmatpush1.bf16.msra.mxu1 %v2863_v7  ;;  %v1802_v7 = vld [vmem:[%s4517_s13 + $0x180] sm:$0xff] }
 0x527   :  { %2865 = vmatprep.subr.bf16.mxu1 %v3226_v17  ;;  %v2941_v11 = vpack.c.bf16 %v1803_v54, %v1802_v7  ;;  %v1797_v7 = vld [vmem:[%s4517_s13 + $0x158] sm:$0xff] }
 0x528   :  { %v2963_v13 = vpack.c.bf16 %v1797_v7, %v1796_v4  ;;  %v2052_v7 = vld [vmem:[#allocation8 + $0x30] sm:$0xff] }
 0x52a   :  { %2867 = vmatpush1.bf16.msra.mxu1 %v2866_v46  ;;  %v1787_v46 = vld [vmem:[%s4517_s13 + $0x108] sm:$0xff] }
 0x52b   :  { %2868 = vmatprep.subr.bf16.mxu1 %v3226_v17 }
 0x52e   :  { %2870 = vmatpush1.bf16.msra.mxu1 %v2869_v12  ;;  %v2943_v12 = vpack.c.bf16 %v1787_v46, %v1786_v9  ;;  %v1767_v9 = vld [vmem:[%s4517_s13 + $0x68] sm:$0xff]  ;;  %v1814_v46 = vld [vmem:[%s4517_s13 + $0x1e0] sm:$0xff] }
 0x52f   :  { %2871 = vmatprep.subr.bf16.mxu1 %v3226_v17 }
 0x532   :  { %2873 = vmatpush1.bf16.msra.mxu1 %v2872_v2  ;;  %v1758_v2 = vld [vmem:[%s4517_s13 + $0x20] sm:$0xff] }
 0x533   :  { %2874 = vmatprep.subr.bf16.mxu1 %v3226_v17  ;;  %v2919_v25 = vpack.c.bf16 %v1759_v18, %v1758_v2  ;;  %v1799_v18 = vld [vmem:[%s4517_s13 + $0x168] sm:$0xff] }
 0x536   :  { %2876 = vmatpush1.bf16.msra.mxu1 %v2875_v43  ;;  %v1804_v43 = vld [vmem:[%s4517_s13 + $0x190] sm:$0xff] }
 0x537   :  { %2877 = vmatprep.subr.bf16.mxu1 %v3226_v17  ;;  %v2945_v36 = vpack.c.bf16 %v1805_v19, %v1804_v43  ;;  %v1768_v19 = vld [vmem:[%s4517_s13 + $0x70] sm:$0xff] }
 0x53a   :  { %2879 = vmatpush1.bf16.msra.mxu1 %v2878_v20  ;;  %v1788_v20 = vld [vmem:[%s4517_s13 + $0x110] sm:$0xff] }
 0x53b   :  { %2880 = vmatprep.subr.bf16.mxu1 %v3226_v17 }
 0x53e   :  { %2882 = vmatpush1.bf16.msra.mxu1 %v2881_v15  ;;  %v2947_v15 = vpack.c.bf16 %v1789_v21, %v1788_v20 }
 0x53f   :  { %2883 = vmatprep.subr.bf16.mxu1 %v3226_v17 }
 0x542   :  { %2885 = vmatpush1.bf16.msra.mxu1 %v2884_v26  ;;  %v1806_v26 = vld [vmem:[%s4517_s13 + $0x1a0] sm:$0xff] }
 0x543   :  { %2886 = vmatprep.subr.bf16.mxu1 %v3226_v17 }
 0x546   :  { %2888 = vmatpush1.bf16.msra.mxu1 %v2887_v29  ;;  %v2921_v29 = vpack.c.bf16 %v1777_v24, %v1776_v23  ;;  %v1817_v24 = vld [vmem:[%s4517_s13 + $0x1f8] sm:$0xff] }
 0x547   :  { %2942 = vmatprep.subr.bf16.mxu1 %v2941_v11  ;;  %v1784_v11 = vld [vmem:[%s4517_s13 + $0xf0] sm:$0xff] }
 0x549   :  { %1535 = vmatmul.mubr.f32.vlgmr.msra.gmra.mrb[32].mxu1 %v1312_v5 }
 0x54a   :  { %2298 = vmatprep.mubr.msk.f32.mxu1 %vm1346_vm14, %v1315_v41  ;;  %2944 = vmatpush3.bf16.msra.mxu1 %v2943_v12  ;;  %v1785_v12 = vld [vmem:[%s4517_s13 + $0xf8] sm:$0xff] }
 0x54b   :  { %2946 = vmatprep.subr.bf16.mxu1 %v2945_v36  ;;  %v2937_v43 = vpack.c.bf16 %v1785_v12, %v1784_v11  ;;  %v1769_v36 = vld [vmem:[%s4517_s13 + $0x78] sm:$0xff]  ;;  %v2056_v11 = vld [vmem:[#allocation8 + $0x50] sm:$0xff]  ;;  %v2057_v12 = vld [vmem:[#allocation8 + $0x58] sm:$0xff] }
 0x54c   :  { %v2939_v21 = vpack.c.bf16 %v1769_v36, %v1768_v19  ;;  %v2140_v36 = vld [vmem:[#allocation10] sm:$0xff] }
 0x54d   :  { %1540 = vmatmul.mubr.f32.gmra.mrb[34].mxu1 %v1314_v45 }
 0x54e   :  { %2299 = vmatprep.mubr.msk.f32.mxu1 %vm1346_vm14, %v1317_v52  ;;  %v1560_v52 = vld [vmem:[%s4515_s11 + $0x8] sm:$0xf]  ;;  %2948 = vmatpush3.bf16.msra.mxu1 %v2947_v15  ;;  %v1816_v15 = vld [vmem:[%s4517_s13 + $0x1f0] sm:$0xff] }
 0x551   :  { %1545 = vmatmul.mubr.f32.gmra.mrb[36].mxu1 %v1316_v56  ;;  %v1770_v56 = vld [vmem:[%s4517_s13 + $0x80] sm:$0xff] }
 0x552   :  { %2300 = vmatprep.mubr.msk.f32.mxu1 %vm1346_vm14, %v1319_v61  ;;  %v2909_v59 = vpack.c.bf16 %v1771_v57, %v1770_v56  ;;  %v1773_v61 = vld [vmem:[%s4517_s13 + $0x98] sm:$0xff] }
 0x553   :  { %v1765_v57 = vld [vmem:[%s4517_s13 + $0x58] sm:$0xff] }
 0x555   :  { %1550 = vmatmul.mubr.f32.gmra.mrb[38].mxu1 %v1318_v63  ;;  %v2913_v63 = vpack.c.bf16 %v1773_v61, %v1772_v38  ;;  %v1783_v38 = vld [vmem:[%s4517_s13 + $0xe8] sm:$0xff] }
 0x556   :  { %v2933_v54 = vpack.c.bf16 %v1783_v38, %v1782_v60  ;;  %v2048_v38 = vld [vmem:[#allocation8 + $0x10] sm:$0xff] }
 0x5e8   :  { %v1425_v10 = vpop.f32.mrb[24].mxu1 }
 0x5e9   :  { %v1427_v31 = vpop.f32.mrb[25].mxu1 }
 0x5ea   :  { %v2949_v31 = vpack.c.bf16 %v1807_v27, %v1806_v26  ;;  %v2969_v26 = vpack.c.bf16 %v1817_v24, %v1816_v15  ;;  %v1800_v27 = vld [vmem:[%s4517_s13 + $0x170] sm:$0xff]  ;;  %v2143_v15 = vld [vmem:[#allocation10 + $0x18] sm:$0xff] }
 0x5ec   :  { %v1430_v32 = vpop.f32.mrb[26].mxu1  ;;  %2950 = vmatprep.subr.bf16.mxu1 %v2949_v31 }
 0x5ed   :  { %v1432_v33 = vpop.f32.mrb[27].mxu1 }
 0x5ee   :  { %v1778_v33 = vld [vmem:[%s4517_s13 + $0xc0] sm:$0xff] }
 0x5f0   :  { %v1435_v34 = vpop.f32.mrb[28].mxu1 }
 0x5f1   :  { %v1437_v35 = vpop.f32.mrb[29].mxu1 }
 0x5f2   :  { %v1808_v35 = vld [vmem:[%s4517_s13 + $0x1b0] sm:$0xff] }
 0x5f4   :  { %v1440_v6 = vpop.f32.mrb[30].mxu1 }
 0x5f5   :  { %v1442_v5 = vpop.f32.mrb[31].mxu1 }
 0x5f6   :  { %v1809_v5 = vld [vmem:[%s4517_s13 + $0x1b8] sm:$0xff] }
 0x61c   :  { %v1536_v8 = vpop.f32.mrb[32].mxu1 }
 0x61d   :  { %v1555_v37 = vmax.f32 %v1425_v10, %v1536_v8  ;;  %v1538_v22 = vpop.f32.mrb[33].mxu1  ;;  %v1761_v10 = vld [vmem:[%s4517_s13 + $0x38] sm:$0xff] }
 0x61e   :  { %v2923_v8 = vpack.c.bf16 %v1761_v10, %v1760_v30  ;;  %v2953_v22 = vpack.c.bf16 %v1809_v5, %v1808_v35  ;;  %v1818_v5 = vld [vmem:[%s4517_s13 + $0x200] sm:$0xff] }
 0x620   :  { %v1541_v39 = vpop.f32.mrb[34].mxu1 }
 0x621   :  { %v1556_v40 = vmax.f32 %v1430_v32, %v1541_v39  ;;  %v1543_v41 = vpop.f32.mrb[35].mxu1  ;;  %v1791_v32 = vld [vmem:[%s4517_s13 + $0x128] sm:$0xff]  ;;  %v1792_v39 = vld [vmem:[%s4517_s13 + $0x130] sm:$0xff] }
 0x623   :  { %v2889_v42 = vpack.c.bf16 %v1556_v40, %v1555_v37  ;;  %v1762_v37 = vld [vmem:[%s4517_s13 + $0x40] sm:$0xff]  ;;  %v1793_v40 = vld [vmem:[%s4517_s13 + $0x138] sm:$0xff] }
 0x624   :  { %v1546_v44 = vpop.f32.mrb[36].mxu1 }
 0x625   :  { %v1557_v45 = vmax.f32 %v1435_v34, %v1546_v44  ;;  %v1548_v47 = vpop.f32.mrb[37].mxu1  ;;  %2890 = vmatprep.subr.bf16.mxu0 %v2889_v42  ;;  %v1779_v34 = vld [vmem:[%s4517_s13 + $0xc8] sm:$0xff]  ;;  %v1810_v44 = vld [vmem:[%s4517_s13 + $0x1c0] sm:$0xff] }
 0x626   :  { %2892 = vmatpush3.bf16.msra.mxu0 %v2889_v42  ;;  %v2925_v41 = vpack.c.bf16 %v1779_v34, %v1778_v33  ;;  %v1780_v47 = vld [vmem:[%s4517_s13 + $0xd0] sm:$0xff] }
 0x628   :  { %v1551_v48 = vpop.f32.mrb[38].mxu1 }
 0x629   :  { %v1558_v49 = vmax.f32 %v1440_v6, %v1551_v48  ;;  %v1553_v50 = vpop.f32.mrb[39].mxu1  ;;  %v2951_v6 = vpack.c.bf16 %v1791_v32, %v1790_v28  ;;  %v1781_v48 = vld [vmem:[%s4517_s13 + $0xd8] sm:$0xff] }
 0x62a   :  { %v2929_v56 = vpack.c.bf16 %v1781_v48, %v1780_v47  ;;  %v1801_v28 = vld [vmem:[%s4517_s13 + $0x178] sm:$0xff] }
 0x62b   :  { %v2893_v51 = vpack.c.bf16 %v1558_v49, %v1557_v45  ;;  %v1811_v45 = vld [vmem:[%s4517_s13 + $0x1c8] sm:$0xff]  ;;  %2952 = vmatpush3.bf16.msra.mxu1 %v2951_v6  ;;  %v2955_v49 = vpack.c.bf16 %v1793_v40, %v1792_v39 }
 0x62c   :  { %2954 = vmatprep.subr.bf16.mxu1 %v2953_v22 }
 0x62d   :  { %2895 = vmatprep.subr.msk.bf16.mxu0 %vm2894_vm1, %v2893_v51 }
 0x62e   :  { %2898 = vmatpush3.bf16.msk.msra.mxu0 %vm2894_vm1, %v2893_v51 }
 0x62f   :  { %2900 = vmatprep.subr.bf16.mxu0 %v2889_v42  ;;  %2956 = vmatpush3.bf16.msra.mxu1 %v2955_v49 }
 0x631   :  { %2513 = vmatmul.mubr.msk.f32.vlgmr.msra.gmra.mrb[40].mxu0 %vm1561_vm15, %v1560_v52  ;;  %v2957_v52 = vpack.c.bf16 %v1811_v45, %v1810_v44  ;;  %v1821_v44 = vld [vmem:[%s4517_s13 + $0x218] sm:$0xff] }
 0x632   :  { %2902 = vmatpush3.bf16.msra.mxu0 %v2889_v42  ;;  %2523 = vmatprep.mubr.msk.f32.mxu0 %vm1561_vm15, %v1647_v55  ;;  %v1763_v42 = vld [vmem:[%s4517_s13 + $0x48] sm:$0xff]  ;;  %v1794_v55 = vld [vmem:[%s4517_s13 + $0x140] sm:$0xff] }
 0x633   :  { %2905 = vmatprep.subr.msk.bf16.mxu0 %vm2894_vm1, %v2893_v51  ;;  %v2927_v50 = vpack.c.bf16 %v1763_v42, %v1762_v37  ;;  %2958 = vmatprep.subr.bf16.mxu1 %v2957_v52  ;;  %v1820_v42 = vld [vmem:[%s4517_s13 + $0x210] sm:$0xff]  ;;  %v1823_v52 = vld [vmem:[%s4517_s13 + $0x228] sm:$0xff] }
 0x634   :  { %v2977_v48 = vpack.c.bf16 %v1821_v44, %v1820_v42 }
 0x636   :  { %2908 = vmatpush3.bf16.msk.msra.mxu0 %vm2894_vm1, %v2893_v51  ;;  %v1764_v51 = vld [vmem:[%s4517_s13 + $0x50] sm:$0xff] }
 0x637   :  { %2910 = vmatprep.subr.bf16.mxu0 %v2909_v59  ;;  %v1813_v59 = vld [vmem:[%s4517_s13 + $0x1d8] sm:$0xff] }
 0x638   :  { %v2961_v3 = vpack.c.bf16 %v1813_v59, %v1812_v58  ;;  %v2046_v58 = vld [vmem:[#allocation8] sm:$0xff]  ;;  %v2047_v59 = vld [vmem:[#allocation8 + $0x8] sm:$0xff] }
 0x639   :  { %2524 = vmatmul.mubr.msk.f32.vlgmr.msra.gmra.mrb[42].mxu0 %vm1561_vm15, %v1648_v53  ;;  %v1795_v53 = vld [vmem:[%s4517_s13 + $0x148] sm:$0xff]  ;;  %v2986_v60 = vpack.c.bf16 %v2047_v59, %v2046_v58 }
 0x63a   :  { %2912 = vmatpush3.bf16.msra.mxu0 %v2911_v62  ;;  %v2959_v61 = vpack.c.bf16 %v1795_v53, %v1794_v55  ;;  %v2931_v62 = vpack.c.bf16 %v1765_v57, %v1764_v51  ;;  %v1822_v51 = vld [vmem:[%s4517_s13 + $0x220] sm:$0xff]  ;;  %v1824_v53 = vld [vmem:[%s4517_s13 + $0x230] sm:$0xff] }
 0x63b   :  { %2914 = vmatprep.subr.bf16.mxu0 %v2913_v63  ;;  %v1766_v63 = vld [vmem:[%s4517_s13 + $0x60] sm:$0xff]  ;;  %v2980_v55 = vpack.c.bf16 %v1823_v52, %v1822_v51 }
 0x63c   :  { %2960 = vmatpush3.bf16.msra.mxu1 %v2959_v61  ;;  %v2935_v14 = vpack.c.bf16 %v1767_v9, %v1766_v63  ;;  %v2049_v61 = vld [vmem:[#allocation8 + $0x18] sm:$0xff]  ;;  %v2050_v63 = vld [vmem:[#allocation8 + $0x20] sm:$0xff]  ;;  %v2154_v52 = vld [vmem:[#allocation10 + $0x70] sm:$0xff] }
 0x63d   :  { %2962 = vmatprep.subr.bf16.mxu1 %v2961_v3  ;;  %v2051_v3 = vld [vmem:[#allocation8 + $0x28] sm:$0xff] }
 0x63e   :  { %2916 = vmatpush3.bf16.msra.mxu0 %v2915_v1  ;;  %v1815_v1 = vld [vmem:[%s4517_s13 + $0x1e8] sm:$0xff]  ;;  %v2992_v4 = vpack.c.bf16 %v2051_v3, %v2050_v63 }
 0x63f   :  { %2918 = vmatprep.subr.bf16.mxu0 %v2917_v16  ;;  %v2965_v2 = vpack.c.bf16 %v1815_v1, %v1814_v46  ;;  %v1798_v16 = vld [vmem:[%s4517_s13 + $0x160] sm:$0xff]  ;;  %v2054_v46 = vld [vmem:[#allocation8 + $0x40] sm:$0xff]  ;;  %v2055_v1 = vld [vmem:[#allocation8 + $0x48] sm:$0xff] }
 0x640   :  { %2964 = vmatpush3.bf16.msra.mxu1 %v2963_v13  ;;  %v2967_v20 = vpack.c.bf16 %v1799_v18, %v1798_v16  ;;  %v3001_v13 = vpack.c.bf16 %v2057_v12, %v2056_v11  ;;  %v2060_v18 = vld [vmem:[#allocation8 + $0x70] sm:$0xff] }
 0x641   :  { %2966 = vmatprep.subr.bf16.mxu1 %v2965_v2  ;;  %v2059_v2 = vld [vmem:[#allocation8 + $0x68] sm:$0xff] }
 0x642   :  { %2920 = vmatpush3.bf16.msra.mxu0 %v2919_v25 }
 0x643   :  { %2922 = vmatprep.subr.bf16.mxu0 %v2921_v29  ;;  %v2971_v29 = vpack.c.bf16 %v1801_v28, %v1800_v27  ;;  %v2146_v28 = vld [vmem:[#allocation10 + $0x30] sm:$0xff] }
 0x644   :  { %2968 = vmatpush3.bf16.msra.mxu1 %v2967_v20  ;;  %v2141_v20 = vld [vmem:[#allocation10 + $0x8] sm:$0xff] }
 0x645   :  { %2970 = vmatprep.subr.bf16.mxu1 %v2969_v26  ;;  %v2145_v26 = vld [vmem:[#allocation10 + $0x28] sm:$0xff] }
 0x646   :  { %2924 = vmatpush3.bf16.msra.mxu0 %v2923_v8  ;;  %v1819_v8 = vld [vmem:[%s4517_s13 + $0x208] sm:$0xff] }
 0x647   :  { %2926 = vmatprep.subr.bf16.mxu0 %v2925_v41  ;;  %v2974_v39 = vpack.c.bf16 %v1819_v8, %v1818_v5  ;;  %v2153_v5 = vld [vmem:[#allocation10 + $0x68] sm:$0xff] }
 0x648   :  { %2972 = vmatpush3.bf16.msra.mxu1 %v2971_v29  ;;  %v2147_v29 = vld [vmem:[#allocation10 + $0x38] sm:$0xff] }
 0x649   :  { %3009 = vmatprep.subr.bf16.mxu1 %v3226_v17 }
 0x64a   :  { %2928 = vmatpush3.bf16.msra.mxu0 %v2927_v50 }
 0x64b   :  { %2930 = vmatprep.subr.bf16.mxu0 %v2929_v56  ;;  %v1825_v56 = vld [vmem:[%s4517_s13 + $0x238] sm:$0xff] }
 0x64c   :  { %v2983_v57 = vpack.c.bf16 %v1825_v56, %v1824_v53  ;;  %v2309_v53 = vld [vmem:[%s4520_s16] ss:$0 sm:$0xff] }
 0x64e   :  { %2932 = vmatpush3.bf16.msra.mxu0 %v2931_v62  ;;  %v2989_v62 = vpack.c.bf16 %v2049_v61, %v2048_v38 }
 0x64f   :  { %2934 = vmatprep.subr.bf16.mxu0 %v2933_v54  ;;  %v2053_v54 = vld [vmem:[#allocation8 + $0x38] sm:$0xff] }
 0x650   :  { %v2995_v9 = vpack.c.bf16 %v2053_v54, %v2052_v7 }
 0x652   :  { %2936 = vmatpush3.bf16.msra.mxu0 %v2935_v14  ;;  %v2058_v14 = vld [vmem:[#allocation8 + $0x60] sm:$0xff] }
 0x653   :  { %2938 = vmatprep.subr.bf16.mxu0 %v2937_v43  ;;  %v3004_v16 = vpack.c.bf16 %v2059_v2, %v2058_v14  ;;  %v2061_v43 = vld [vmem:[#allocation8 + $0x78] sm:$0xff] }
 0x654   :  { %v3007_v19 = vpack.c.bf16 %v2061_v43, %v2060_v18 }
 0x656   :  { %2940 = vmatpush3.bf16.msra.mxu0 %v2939_v21  ;;  %v2142_v21 = vld [vmem:[#allocation10 + $0x10] sm:$0xff] }
 0x657   :  { %2973 = vmatprep.subr.bf16.mxu0 %v3226_v17  ;;  %v3013_v24 = vpack.c.bf16 %v2143_v15, %v2142_v21 }
 0x704   :  { %v2514_v23 = vpop.f32.mrb[40].mxu0 }
 0x705   :  { %v1638_v25 = vpop.f32.mrb[41].mxu0 }
 0x70c   :  { %v2525_v30 = vpop.f32.mrb[42].mxu0 }
 0x70d   :  { %v1731_v10 = vmax.f32 %v2514_v23, %v2525_v30  ;;  %v1721_v31 = vpop.f32.mrb[43].mxu0  ;;  %v3010_v23 = vpack.c.bf16 %v2141_v20, %v2140_v36  ;;  %v3019_v30 = vpack.c.bf16 %v2147_v29, %v2146_v28 }
 0x70e   :  { %v1730_v32 = vmax.f32 %v1638_v25, %v1721_v31  ;;  %v2144_v25 = vld [vmem:[#allocation10 + $0x20] sm:$0xff]  ;;  %v2149_v31 = vld [vmem:[#allocation10 + $0x48] sm:$0xff] }
 0x70f   :  { %v1746_v35 = vrot.slane %v1731_v10, 2  ;;  %v3016_v27 = vpack.c.bf16 %v2145_v26, %v2144_v25 }
 0x710   :  { %v1737_v33 = vrot.slane %v1730_v32, 4  ;;  %v1733_v34 = vrot.slane %v1730_v32, 2  ;;  %v1741_v6 = vrot.slane %v1730_v32, 6 }
 0x712   :  { %1738 = vrot.lane.b32.xlu1 %v1737_v33, %s3225_s4  ;;  %1734 = vrot.lane.b32.xlu0 %v1733_v34, %s3230_s29  ;;  %v2150_v33 = vld [vmem:[#allocation10 + $0x50] sm:$0xff]  ;;  %v2151_v34 = vld [vmem:[#allocation10 + $0x58] sm:$0xff] }
 0x716   :  { %1742 = vrot.lane.b32.xlu1 %v1741_v6, %s3224_s3  ;;  %1747 = vrot.lane.b32.xlu0 %v1746_v35, %s3230_s29  ;;  %v3025_v35 = vpack.c.bf16 %v2151_v34, %v2150_v33  ;;  %v2152_v6 = vld [vmem:[#allocation10 + $0x60] sm:$0xff] }
 0x717   :  { %v3028_v8 = vpack.c.bf16 %v2153_v5, %v2152_v6 }
 0x784   :  { %v1739_v37 = vpop.permute.xlu1 %1738  ;;  %v1735_v22 = vpop.permute.xlu0 %1734 }
 0x785   :  { %v1750_v40 = vsel %vm293_vm4, %v1730_v32, %v1735_v22  ;;  %v1751_v41 = vsel %vm189_vm3, %v1735_v22, %v1739_v37 }
 0x786   :  { %1899 = vmatprep.mubr.f32.mxu0 %v1751_v41 }
 0x787   :  { %1900 = vmatmul.mubr.f32.vlgmr.msra.gmra.mrb[44].mxu0 %v1750_v40  ;;  %v2307_v40 = vld [vmem:[%s4518_s14] ss:$0 sm:$0xff] }
 0x788   :  { %2975 = vmatpush3.bf16.msra.mxu0 %v2974_v39  ;;  %v1743_v45 = vpop.permute.xlu1 %1742  ;;  %v1748_v47 = vpop.permute.xlu0 %1747  ;;  %2542 = vmatprep.mubr.msk.f32.mxu0 %vm3231_vm5, %v3223_v0 }
 0x789   :  { %v1752_v49 = vsel %vm184_vm2, %v1739_v37, %v1743_v45  ;;  %v1753_v50 = vsel %vm293_vm4, %v1731_v10, %v1748_v47  ;;  %2976 = vmatprep.subr.bf16.mxu0 %v3226_v17  ;;  %v2148_v10 = vld [vmem:[#allocation10 + $0x40] sm:$0xff] }
 0x78a   :  { %1969 = vmatprep.mubr.f32.mxu1 %v1753_v50  ;;  %v3022_v32 = vpack.c.bf16 %v2149_v31, %v2148_v10 }
 0x78b   :  { %1970 = vmatmul.mubr.f32.vlgmr.msra.gmra.mrb[40].mxu1 %v1752_v49 }
 0x78c   :  { %2978 = vmatpush3.bf16.msra.mxu0 %v2977_v48  ;;  %2612 = vmatprep.mubr.msk.f32.mxu1 %vm3231_vm5, %v3223_v0 }
 0x78d   :  { %2979 = vmatprep.subr.bf16.mxu0 %v3226_v17  ;;  %3011 = vmatpush3.bf16.msra.mxu1 %v3010_v23 }
 0x78e   :  { %3012 = vmatprep.subr.bf16.mxu1 %v3226_v17 }
 0x790   :  { %2981 = vmatpush3.bf16.msra.mxu0 %v2980_v55  ;;  %v2155_v55 = vld [vmem:[#allocation10 + $0x78] sm:$0xff] }
 0x791   :  { %2982 = vmatprep.subr.bf16.mxu0 %v3226_v17  ;;  %3014 = vmatpush3.bf16.msra.mxu1 %v3013_v24 }
 0x792   :  { %3015 = vmatprep.subr.bf16.mxu1 %v3226_v17 }
 0x794   :  { %2984 = vmatpush3.bf16.msra.mxu0 %v2983_v57 }
 0x795   :  { %2985 = vmatprep.subr.bf16.mxu0 %v3226_v17  ;;  %3017 = vmatpush3.bf16.msra.mxu1 %v3016_v27 }
 0x796   :  { %3018 = vmatprep.subr.bf16.mxu1 %v3226_v17 }
 0x797   :  { %2543 = vmatmul.mubr.msk.f32.vlgmr.msra.gmra.mrb[46].mxu0 %vm189_vm3, %v1748_v47 }
 0x798   :  { %2987 = vmatpush3.bf16.msra.mxu0 %v2986_v60  ;;  %2577 = vmatprep.mubr.msk.f32.mxu0 %vm3231_vm5, %v3223_v0  ;;  %v2998_v0 = vpack.c.bf16 %v2055_v1, %v2054_v46  ;;  %v2310_v60 = vld [vmem:[%s4542_s21] ss:$0 sm:$0xff] }
 0x799   :  { %2988 = vmatprep.subr.bf16.mxu0 %v3226_v17  ;;  %3020 = vmatpush3.bf16.msra.mxu1 %v3019_v30 }
 0x79a   :  { %3021 = vmatprep.subr.bf16.mxu1 %v3226_v17 }
 0x79c   :  { %2990 = vmatpush3.bf16.msra.mxu0 %v2989_v62 }
 0x79d   :  { %2991 = vmatprep.subr.bf16.mxu0 %v3226_v17  ;;  %3023 = vmatpush3.bf16.msra.mxu1 %v3022_v32 }
 0x79e   :  { %3024 = vmatprep.subr.bf16.mxu1 %v3226_v17 }
 0x7a0   :  { %2993 = vmatpush3.bf16.msra.mxu0 %v2992_v4 }
 0x7a1   :  { %2994 = vmatprep.subr.bf16.mxu0 %v3226_v17  ;;  %3026 = vmatpush3.bf16.msra.mxu1 %v3025_v35 }
 0x7a2   :  { %3027 = vmatprep.subr.bf16.mxu1 %v3226_v17 }
 0x7a4   :  { %2996 = vmatpush3.bf16.msra.mxu0 %v2995_v9 }
 0x7a5   :  { %2997 = vmatprep.subr.bf16.mxu0 %v3226_v17  ;;  %3029 = vmatpush3.bf16.msra.mxu1 %v3028_v8 }
 0x7a6   :  { %3030 = vmatprep.subr.bf16.mxu1 %v3226_v17 }
 0x7a8   :  { %2999 = vmatpush3.bf16.msra.mxu0 %v2998_v0 }
 0x7a9   :  { %3000 = vmatprep.subr.bf16.mxu0 %v3226_v17 }
 0x7ac   :  { %3002 = vmatpush3.bf16.msra.mxu0 %v3001_v13 }
 0x7ad   :  { %3003 = vmatprep.subr.bf16.mxu0 %v3226_v17 }
 0x7b0   :  { %3005 = vmatpush3.bf16.msra.mxu0 %v3004_v16 }
 0x7b1   :  { %3006 = vmatprep.subr.bf16.mxu0 %v3226_v17  ;;  %v3031_v17 = vpack.c.bf16 %v2155_v55, %v2154_v52 }
 0x7b3   :  { %3032 = vmatpush3.bf16.msra.mxu1 %v3031_v17 }
 0x7b4   :  { %3008 = vmatpush3.bf16.msra.mxu0 %v3007_v19 }
 0x85a   :  { %v2379_v37 = vpop.f32.mrb[44].mxu0 }
 0x85b   :  { %v2380_v22 = vpop.f32.mrb[45].mxu0 }
 0x85c   :  { %v2381_v39 = vadd.f32 %v2380_v22, %v2379_v37 }
 0x85e   :  { %v2414_v41 = vpop.f32.mrb[40].mxu1  ;;  %v1902_v44 = vadd.f32 %v2381_v39, %v2307_v40 }
 0x85f   :  { %v2415_v42 = vpop.f32.mrb[41].mxu1 }
 0x860   :  { %v2416_v45 = vadd.f32 %v2415_v42, %v2414_v41 }
 0x862   :  { %v1972_v47 = vadd.f32 %v2416_v45, %v1902_v44 }
 0x86a   :  { %v2041_v48 = vpop.f32.mrb[46].mxu0 }
 0x86b   :  { %v2042_v49 = vadd.f32 %v2041_v48, %v1972_v47  ;;  %v2544_v50 = vpop.f32.mrb[47].mxu0 }
 0x86d   :  { %v2045_v51 = vmax.f32 %v2042_v49, 0.0 }
 0x86f   :  { %2578 = vmatmul.mubr.f32.vlgmr.msra.gmra.mrb[48].mxu0 %v2045_v51 }
 0x942   :  { %v2135_v56 = vpop.f32.mrb[48].mxu0 }
 0x943   :  { %v2136_v57 = vadd.f32 %v2309_v53, %v2135_v56  ;;  %v2579_v58 = vpop.f32.mrb[49].mxu0 }
 0x945   :  { %v2139_v59 = vmax.f32 %v2136_v57, 0.0 }
 0x947   :  { %2613 = vmatmul.mubr.f32.vlgmr.msra.gmra.mrb[42].mxu1 %v2139_v59 }
 0xa1a   :  { %v2229_v38 = vpop.f32.mrb[42].mxu1 }
 0xa1b   :  { %v2230_v61 = vadd.f32 %v2310_v60, %v2229_v38  ;;  %v2614_v62 = vpop.f32.mrb[43].mxu1 }
 0xa1d   :  { %2233 = vst [vmem:[#allocation11] sm:$0x3] %v2230_v61 }
 0xa1e   :  { %3197 = shalt.err (!%p3194_p2)
}
 0xa1f   :  { %s4543_s0 = sld [smem:[#allocation21_spill]] }
 0xa25   :  { %s3198_s18 = scalar_lea.hbm %s4543_s0, 32 }
 0xa26   :  { %p3199_p3 = scmp.ne.s32.totalorder %s4543_s0, %s3198_s18  ;;  %p3202_p4 = scmp.lt.u32.totalorder %s3198_s18, %s4543_s0 }
 0xa28   :  { %p3204_p5 = pnand %p3202_p4, %p3199_p3 }
 0xa2a   :  { %3207 = shalt.err (!%p3204_p5)
}
 0xa2b   :  { %2243 = dma.vmem_to_hbm [thread:$0]  %s2241_s5, 32, %s4543_s0, [#allocation4]  }
 0xa2c   :  { %3214 = dma.done.wait [#allocation4], 32  }
 0xa2d   :  { %3215 = vsyncadd [#allocation4], 4294967264 }
 0xa2e   :  { %2247 = vsyncpa [#allocation3], 1 }
 0xa2f   :  { %2248 = vsyncpa [#allocation6], 1 }
 0xa30   :  { %2249 = vsyncpa [#allocation9], 1 }
 0xa31   :  { %2250 = vsyncpa [#allocation4], 1 }

</bundles_post_ra>
